<compile_context>
chip_gen: v6e
topology: v6e:2x2x1
jax: 0.10.0
libtpu: 0.0.40
codegen_flags: <defaults>
</compile_context>

<pallas_src>
import functools

import jax
import jax.numpy as jnp
from jax import lax
from jax.experimental import pallas as pl
from jax.experimental.pallas import tpu as pltpu


def _attention_kernel(x_ref, wqkv_ref, wproj_ref, bproj_ref, o_ref, *,
                      block_b, seq_len, num_heads, head_dim, scale):
    """One grid step = `block_b` whole batch elements (block_b * seq_len rows).

    x_ref    : (block_b*N, C)  VMEM, native dtype, fed to the MXU as-is
    wqkv_ref : (C, 3C)         VMEM, resident across the grid
    wproj_ref: (C, C)          VMEM, resident across the grid
    bproj_ref: (1, C)          VMEM
    o_ref    : (block_b*N, C)  VMEM
    """
    C = num_heads * head_dim

    # --- QKV projection: one lane-dense matmul over all folded batch rows.
    qkv = jnp.dot(x_ref[...], wqkv_ref[...],
                  preferred_element_type=jnp.float32)          # (rows, 3C) f32

    # Scale q once (rows*C mults) instead of scaling the (N, N) scores per head.
    q_all = qkv[:, :C] * scale
    k_all = qkv[:, C:2 * C]
    v_all = qkv[:, 2 * C:3 * C]

    # --- Per (batch, head) scaled-dot-product attention, kept in vregs.
    # Static slices (Python loop is unrolled at trace time); no scratch buffers.
    batch_outs = []
    for b in range(block_b):
        r = b * seq_len
        head_outs = []
        for h in range(num_heads):
            c = h * head_dim
            q = q_all[r:r + seq_len, c:c + head_dim]           # (N, hd) f32
            k = k_all[r:r + seq_len, c:c + head_dim]
            v = v_all[r:r + seq_len, c:c + head_dim]

            # q @ k^T via contraction on the head dim (no explicit transpose).
            s = lax.dot_general(q, k, (((1,), (1,)), ((), ())),
                                preferred_element_type=jnp.float32)   # (N, N)
            s = s - jnp.max(s, axis=-1, keepdims=True)
            p = jnp.exp(s)
            # approx reciprocal -> EUP vrcp slot (otherwise idle), off the VALU path.
            p = p * pl.reciprocal(jnp.sum(p, axis=-1, keepdims=True), approx=True)

            head_outs.append(jnp.dot(p, v, preferred_element_type=jnp.float32))
        # Lane-contiguous (N, C) slab assembled in registers.
        batch_outs.append(head_outs[0] if num_heads == 1
                          else jnp.concatenate(head_outs, axis=-1))
    y = batch_outs[0] if block_b == 1 else jnp.concatenate(batch_outs, axis=0)

    # --- Output projection on the full folded row block (large MXU LHS tile).
    y = y.astype(wproj_ref.dtype)
    out = jnp.dot(y, wproj_ref[...], preferred_element_type=jnp.float32)
    out = out + bproj_ref[...].astype(jnp.float32)
    o_ref[...] = out.astype(o_ref.dtype)


def attention_forward(x, wqkv_t, wproj_t, bproj, *, num_heads, block_b=None):
    """x: (B, N, C); wqkv_t: (C, 3C); wproj_t: (C, C); bproj: (1, C)."""
    B, N, C = x.shape
    assert C % num_heads == 0, "dim should be divisible by num_heads"
    head_dim = C // num_heads
    scale = head_dim ** -0.5
    itemsize = x.dtype.itemsize

    # Fold whole batch elements into the matmul row dimension until the MXU LHS
    # has ~256 rows (v6e/v7x systolic height), but keep the grid batch-parallel
    # for long sequences.
    if block_b is None:
        block_b = max(1, min(B, 256 // N)) if (N % 8 == 0 and N < 256) else 1
    block_b = max(1, min(block_b, B))
    # Cap block size so double-buffered I/O + f32 intermediates stay well inside
    # VMEM (v7x has 64 MiB per TensorCore; leave generous headroom).
    def _vmem_bytes(bb):
        rows = bb * N
        io = 2 * rows * C * itemsize * 2                      # x + out, 2 buffers
        w = (C * 3 * C + C * C + C) * itemsize * 2
        inter = rows * 3 * C * 4 + num_heads * N * N * 4 + rows * C * 4
        return io + w + inter
    while block_b > 1 and _vmem_bytes(block_b) > (20 << 20):
        block_b -= 1
    while B % block_b:
        block_b -= 1
    rows = block_b * N
    # The block row count must be 8-divisible unless it spans the whole array.
    if rows % 8 != 0 and block_b != B:
        block_b, rows = B, B * N
    grid = (B // block_b,)

    # Fold batch into rows -> purely 2-D, lane-dense blocks for the kernel.
    x2 = x.reshape(B * N, C)

    kernel = functools.partial(_attention_kernel, block_b=block_b, seq_len=N,
                               num_heads=num_heads, head_dim=head_dim,
                               scale=scale)

    flops = (2 * B * N * C * 3 * C                       # qkv projection
             + 4 * B * num_heads * N * N * head_dim      # q@k^T and attn@v
             + 2 * B * N * C * C)                        # output projection
    cost = pl.CostEstimate(
        flops=int(flops),
        transcendentals=int(B * num_heads * N * N),
        bytes_accessed=int((2 * B * N * C + C * 3 * C + C * C + C) * itemsize))

    out2 = pl.pallas_call(
        kernel,
        out_shape=jax.ShapeDtypeStruct((B * N, C), x.dtype),
        grid_spec=pltpu.PrefetchScalarGridSpec(
            num_scalar_prefetch=0,
            grid=grid,
            in_specs=[
                pl.BlockSpec((rows, C), lambda i: (i, 0)),       # folded x rows
                pl.BlockSpec((C, 3 * C), lambda i: (0, 0)),      # Wqkv (resident)
                pl.BlockSpec((C, C), lambda i: (0, 0)),          # Wproj (resident)
                pl.BlockSpec((1, C), lambda i: (0, 0)),          # bproj
            ],
            out_specs=pl.BlockSpec((rows, C), lambda i: (i, 0)),
        ),
        compiler_params=pltpu.CompilerParams(
            dimension_semantics=("parallel",)),   # batch blocks are independent
        cost_estimate=cost,
    )(x2, wqkv_t, wproj_t, bproj)
    # TODO(synk): at production N/C, tile the grid over query blocks with
    # flash-style online softmax over K/V instead of materializing (N, N) scores.
    return out2.reshape(B, N, C)


def attention_reference(x, wqkv_t, wproj_t, bproj, *, num_heads):
    """Pure-JAX reference matching the PyTorch forward."""
    B, N, C = x.shape
    hd = C // num_heads
    scale = hd ** -0.5
    qkv = jnp.einsum('bnc,cd->bnd', x, wqkv_t)              # (B, N, 3C)
    qkv = qkv.reshape(B, N, 3, num_heads, hd).transpose(2, 0, 3, 1, 4)
    q, k, v = qkv[0], qkv[1], qkv[2]                        # (B, H, N, hd)
    attn = jnp.einsum('bhnd,bhmd->bhnm', q, k) * scale
    attn = jax.nn.softmax(attn, axis=-1)
    y = jnp.einsum('bhnm,bhmd->bhnd', attn, v)              # (B, H, N, hd)
    y = y.transpose(0, 2, 1, 3).reshape(B, N, C)
    return jnp.einsum('bnc,cd->bnd', y, wproj_t) + bproj[0]


if __name__ == "__main__":
    # Small shapes consistent with the module: B=2, N(seq)=8, C(dim)=32, heads=8.
    B, N, C = 2, 8, 32
    NUM_HEADS = 8

    key = jax.random.PRNGKey(0)
    kx, kq, kp, kb = jax.random.split(key, 4)

    x = jax.random.normal(kx, (B, N, C), dtype=jnp.float32)
    # nn.Linear(dim, 3*dim, bias=False): weight (3C, C); store transposed (C, 3C).
    wqkv_t = jax.random.normal(kq, (C, 3 * C), dtype=jnp.float32) * (C ** -0.5)
    # nn.Linear(dim, dim): weight (C, C) + bias (C,); store transposed / as (1, C).
    wproj_t = jax.random.normal(kp, (C, C), dtype=jnp.float32) * (C ** -0.5)
    bproj = jax.random.normal(kb, (1, C), dtype=jnp.float32) * 0.01

    out = attention_forward(x, wqkv_t, wproj_t, bproj, num_heads=NUM_HEADS)
    out = jax.block_until_ready(out)

    ref = attention_reference(x, wqkv_t, wproj_t, bproj, num_heads=NUM_HEADS)
    assert out.shape == (B, N, C)
    # Tolerance accounts for the approximate (EUP vrcp) softmax reciprocal
    # (~1e-3 relative); real structural bugs produce O(0.1+) errors.
    assert jnp.allclose(out, ref, atol=1e-2, rtol=1e-2), "mismatch vs reference"

    print("KERNEL_OK")
</pallas_src>

<mosaic_0001>
module attributes {stable_mosaic.version = 11 : i64} {
  func.func @_attention_kernel(%arg0: i32, %arg1: memref<16x32xf32, #tpu.memory_space<vmem>>, %arg2: memref<32x96xf32, #tpu.memory_space<vmem>>, %arg3: memref<32x32xf32, #tpu.memory_space<vmem>>, %arg4: memref<1x32xf32, #tpu.memory_space<vmem>>, %arg5: memref<16x32xf32, #tpu.memory_space<vmem>>) attributes {dimension_semantics = [#tpu.dimension_semantics<parallel>], iteration_bounds = array<i64: 1>, scalar_prefetch = 0 : i64, scratch_operands = 0 : i64, tpu.core_type = #tpu.core_type<tc>, window_params = [{transform_indices = @transform_0, window_bounds = array<i64: 16, 32>}, {pipeline_mode = #tpu.pipeline_mode<synchronous>, transform_indices = @transform_1, window_bounds = array<i64: 32, 96>}, {pipeline_mode = #tpu.pipeline_mode<synchronous>, transform_indices = @transform_2, window_bounds = array<i64: 32, 32>}, {pipeline_mode = #tpu.pipeline_mode<synchronous>, transform_indices = @transform_3, window_bounds = array<i64: 1, 32>}, {transform_indices = @transform_4, window_bounds = array<i64: 16, 32>}]} {
    %c0 = arith.constant 0 : index
    %c0_0 = arith.constant 0 : index
    %0 = vector.load %arg1[%c0, %c0_0] : memref<16x32xf32, #tpu.memory_space<vmem>>, vector<16x32xf32>
    %c0_1 = arith.constant 0 : index
    %c0_2 = arith.constant 0 : index
    %1 = vector.load %arg2[%c0_1, %c0_2] : memref<32x96xf32, #tpu.memory_space<vmem>>, vector<32x96xf32>
    %cst = arith.constant dense<0.000000e+00> : vector<16x96xf32>
    %2 = tpu.matmul %0, %1, %cst {dimension_numbers = #tpu.dot_dimension_numbers<[1], [0], [0], [1], [0, 0, 1, 1], [], []>} : vector<16x32xf32>, vector<32x96xf32>, vector<16x96xf32> -> vector<16x96xf32>
    %3 = vector.extract_strided_slice %2 {offsets = [0, 0], sizes = [16, 32], strides = [1, 1]} : vector<16x96xf32> to vector<16x32xf32>
    %cst_3 = arith.constant 5.000000e-01 : f32
    %4 = vector.broadcast %cst_3 : f32 to vector<16x32xf32>
    %5 = arith.mulf %3, %4 : vector<16x32xf32>
    %6 = vector.extract_strided_slice %2 {offsets = [0, 32], sizes = [16, 32], strides = [1, 1]} : vector<16x96xf32> to vector<16x32xf32>
    %7 = vector.extract_strided_slice %2 {offsets = [0, 64], sizes = [16, 32], strides = [1, 1]} : vector<16x96xf32> to vector<16x32xf32>
    %8 = vector.extract_strided_slice %5 {offsets = [0, 0], sizes = [8, 4], strides = [1, 1]} : vector<16x32xf32> to vector<8x4xf32>
    %9 = vector.extract_strided_slice %6 {offsets = [0, 0], sizes = [8, 4], strides = [1, 1]} : vector<16x32xf32> to vector<8x4xf32>
    %10 = vector.extract_strided_slice %7 {offsets = [0, 0], sizes = [8, 4], strides = [1, 1]} : vector<16x32xf32> to vector<8x4xf32>
    %cst_4 = arith.constant dense<0.000000e+00> : vector<8x8xf32>
    %11 = tpu.matmul %8, %9, %cst_4 {dimension_numbers = #tpu.dot_dimension_numbers<[1], [1], [0], [0], [0, 0, 1, 0], [], []>} : vector<8x4xf32>, vector<8x4xf32>, vector<8x8xf32> -> vector<8x8xf32>
    %cst_5 = arith.constant dense<0xFF800000> : vector<8xf32>
    %12 = vector.multi_reduction <maximumf>, %11, %cst_5 [1] : vector<8x8xf32> to vector<8xf32>
    %13 = vector.shape_cast %12 : vector<8xf32> to vector<8x1xf32>
    %14 = vector.broadcast %13 : vector<8x1xf32> to vector<8x8xf32>
    %15 = arith.subf %11, %14 : vector<8x8xf32>
    %16 = math.exp %15 : vector<8x8xf32>
    %cst_6 = arith.constant dense<0.000000e+00> : vector<8xf32>
    %17 = vector.multi_reduction <add>, %16, %cst_6 [1] : vector<8x8xf32> to vector<8xf32>
    %18 = vector.shape_cast %17 : vector<8xf32> to vector<8x1xf32>
    %19 = tpu.reciprocal %18 {approx = true} : vector<8x1xf32> -> vector<8x1xf32>
    %20 = vector.broadcast %19 : vector<8x1xf32> to vector<8x8xf32>
    %21 = arith.mulf %16, %20 : vector<8x8xf32>
    %cst_7 = arith.constant dense<0.000000e+00> : vector<8x4xf32>
    %22 = tpu.matmul %21, %10, %cst_7 {dimension_numbers = #tpu.dot_dimension_numbers<[1], [0], [0], [1], [0, 0, 1, 1], [], []>} : vector<8x8xf32>, vector<8x4xf32>, vector<8x4xf32> -> vector<8x4xf32>
    %23 = vector.extract_strided_slice %5 {offsets = [0, 4], sizes = [8, 4], strides = [1, 1]} : vector<16x32xf32> to vector<8x4xf32>
    %24 = vector.extract_strided_slice %6 {offsets = [0, 4], sizes = [8, 4], strides = [1, 1]} : vector<16x32xf32> to vector<8x4xf32>
    %25 = vector.extract_strided_slice %7 {offsets = [0, 4], sizes = [8, 4], strides = [1, 1]} : vector<16x32xf32> to vector<8x4xf32>
    %cst_8 = arith.constant dense<0.000000e+00> : vector<8x8xf32>
    %26 = tpu.matmul %23, %24, %cst_8 {dimension_numbers = #tpu.dot_dimension_numbers<[1], [1], [0], [0], [0, 0, 1, 0], [], []>} : vector<8x4xf32>, vector<8x4xf32>, vector<8x8xf32> -> vector<8x8xf32>
    %cst_9 = arith.constant dense<0xFF800000> : vector<8xf32>
    %27 = vector.multi_reduction <maximumf>, %26, %cst_9 [1] : vector<8x8xf32> to vector<8xf32>
    %28 = vector.shape_cast %27 : vector<8xf32> to vector<8x1xf32>
    %29 = vector.broadcast %28 : vector<8x1xf32> to vector<8x8xf32>
    %30 = arith.subf %26, %29 : vector<8x8xf32>
    %31 = math.exp %30 : vector<8x8xf32>
    %cst_10 = arith.constant dense<0.000000e+00> : vector<8xf32>
    %32 = vector.multi_reduction <add>, %31, %cst_10 [1] : vector<8x8xf32> to vector<8xf32>
    %33 = vector.shape_cast %32 : vector<8xf32> to vector<8x1xf32>
    %34 = tpu.reciprocal %33 {approx = true} : vector<8x1xf32> -> vector<8x1xf32>
    %35 = vector.broadcast %34 : vector<8x1xf32> to vector<8x8xf32>
    %36 = arith.mulf %31, %35 : vector<8x8xf32>
    %cst_11 = arith.constant dense<0.000000e+00> : vector<8x4xf32>
    %37 = tpu.matmul %36, %25, %cst_11 {dimension_numbers = #tpu.dot_dimension_numbers<[1], [0], [0], [1], [0, 0, 1, 1], [], []>} : vector<8x8xf32>, vector<8x4xf32>, vector<8x4xf32> -> vector<8x4xf32>
    %38 = vector.extract_strided_slice %5 {offsets = [0, 8], sizes = [8, 4], strides = [1, 1]} : vector<16x32xf32> to vector<8x4xf32>
    %39 = vector.extract_strided_slice %6 {offsets = [0, 8], sizes = [8, 4], strides = [1, 1]} : vector<16x32xf32> to vector<8x4xf32>
    %40 = vector.extract_strided_slice %7 {offsets = [0, 8], sizes = [8, 4], strides = [1, 1]} : vector<16x32xf32> to vector<8x4xf32>
    %cst_12 = arith.constant dense<0.000000e+00> : vector<8x8xf32>
    %41 = tpu.matmul %38, %39, %cst_12 {dimension_numbers = #tpu.dot_dimension_numbers<[1], [1], [0], [0], [0, 0, 1, 0], [], []>} : vector<8x4xf32>, vector<8x4xf32>, vector<8x8xf32> -> vector<8x8xf32>
    %cst_13 = arith.constant dense<0xFF800000> : vector<8xf32>
    %42 = vector.multi_reduction <maximumf>, %41, %cst_13 [1] : vector<8x8xf32> to vector<8xf32>
    %43 = vector.shape_cast %42 : vector<8xf32> to vector<8x1xf32>
    %44 = vector.broadcast %43 : vector<8x1xf32> to vector<8x8xf32>
    %45 = arith.subf %41, %44 : vector<8x8xf32>
    %46 = math.exp %45 : vector<8x8xf32>
    %cst_14 = arith.constant dense<0.000000e+00> : vector<8xf32>
    %47 = vector.multi_reduction <add>, %46, %cst_14 [1] : vector<8x8xf32> to vector<8xf32>
    %48 = vector.shape_cast %47 : vector<8xf32> to vector<8x1xf32>
    %49 = tpu.reciprocal %48 {approx = true} : vector<8x1xf32> -> vector<8x1xf32>
    %50 = vector.broadcast %49 : vector<8x1xf32> to vector<8x8xf32>
    %51 = arith.mulf %46, %50 : vector<8x8xf32>
    %cst_15 = arith.constant dense<0.000000e+00> : vector<8x4xf32>
    %52 = tpu.matmul %51, %40, %cst_15 {dimension_numbers = #tpu.dot_dimension_numbers<[1], [0], [0], [1], [0, 0, 1, 1], [], []>} : vector<8x8xf32>, vector<8x4xf32>, vector<8x4xf32> -> vector<8x4xf32>
    %53 = vector.extract_strided_slice %5 {offsets = [0, 12], sizes = [8, 4], strides = [1, 1]} : vector<16x32xf32> to vector<8x4xf32>
    %54 = vector.extract_strided_slice %6 {offsets = [0, 12], sizes = [8, 4], strides = [1, 1]} : vector<16x32xf32> to vector<8x4xf32>
    %55 = vector.extract_strided_slice %7 {offsets = [0, 12], sizes = [8, 4], strides = [1, 1]} : vector<16x32xf32> to vector<8x4xf32>
    %cst_16 = arith.constant dense<0.000000e+00> : vector<8x8xf32>
    %56 = tpu.matmul %53, %54, %cst_16 {dimension_numbers = #tpu.dot_dimension_numbers<[1], [1], [0], [0], [0, 0, 1, 0], [], []>} : vector<8x4xf32>, vector<8x4xf32>, vector<8x8xf32> -> vector<8x8xf32>
    %cst_17 = arith.constant dense<0xFF800000> : vector<8xf32>
    %57 = vector.multi_reduction <maximumf>, %56, %cst_17 [1] : vector<8x8xf32> to vector<8xf32>
    %58 = vector.shape_cast %57 : vector<8xf32> to vector<8x1xf32>
    %59 = vector.broadcast %58 : vector<8x1xf32> to vector<8x8xf32>
    %60 = arith.subf %56, %59 : vector<8x8xf32>
    %61 = math.exp %60 : vector<8x8xf32>
    %cst_18 = arith.constant dense<0.000000e+00> : vector<8xf32>
    %62 = vector.multi_reduction <add>, %61, %cst_18 [1] : vector<8x8xf32> to vector<8xf32>
    %63 = vector.shape_cast %62 : vector<8xf32> to vector<8x1xf32>
    %64 = tpu.reciprocal %63 {approx = true} : vector<8x1xf32> -> vector<8x1xf32>
    %65 = vector.broadcast %64 : vector<8x1xf32> to vector<8x8xf32>
    %66 = arith.mulf %61, %65 : vector<8x8xf32>
    %cst_19 = arith.constant dense<0.000000e+00> : vector<8x4xf32>
    %67 = tpu.matmul %66, %55, %cst_19 {dimension_numbers = #tpu.dot_dimension_numbers<[1], [0], [0], [1], [0, 0, 1, 1], [], []>} : vector<8x8xf32>, vector<8x4xf32>, vector<8x4xf32> -> vector<8x4xf32>
    %68 = vector.extract_strided_slice %5 {offsets = [0, 16], sizes = [8, 4], strides = [1, 1]} : vector<16x32xf32> to vector<8x4xf32>
    %69 = vector.extract_strided_slice %6 {offsets = [0, 16], sizes = [8, 4], strides = [1, 1]} : vector<16x32xf32> to vector<8x4xf32>
    %70 = vector.extract_strided_slice %7 {offsets = [0, 16], sizes = [8, 4], strides = [1, 1]} : vector<16x32xf32> to vector<8x4xf32>
    %cst_20 = arith.constant dense<0.000000e+00> : vector<8x8xf32>
    %71 = tpu.matmul %68, %69, %cst_20 {dimension_numbers = #tpu.dot_dimension_numbers<[1], [1], [0], [0], [0, 0, 1, 0], [], []>} : vector<8x4xf32>, vector<8x4xf32>, vector<8x8xf32> -> vector<8x8xf32>
    %cst_21 = arith.constant dense<0xFF800000> : vector<8xf32>
    %72 = vector.multi_reduction <maximumf>, %71, %cst_21 [1] : vector<8x8xf32> to vector<8xf32>
    %73 = vector.shape_cast %72 : vector<8xf32> to vector<8x1xf32>
    %74 = vector.broadcast %73 : vector<8x1xf32> to vector<8x8xf32>
    %75 = arith.subf %71, %74 : vector<8x8xf32>
    %76 = math.exp %75 : vector<8x8xf32>
    %cst_22 = arith.constant dense<0.000000e+00> : vector<8xf32>
    %77 = vector.multi_reduction <add>, %76, %cst_22 [1] : vector<8x8xf32> to vector<8xf32>
    %78 = vector.shape_cast %77 : vector<8xf32> to vector<8x1xf32>
    %79 = tpu.reciprocal %78 {approx = true} : vector<8x1xf32> -> vector<8x1xf32>
    %80 = vector.broadcast %79 : vector<8x1xf32> to vector<8x8xf32>
    %81 = arith.mulf %76, %80 : vector<8x8xf32>
    %cst_23 = arith.constant dense<0.000000e+00> : vector<8x4xf32>
    %82 = tpu.matmul %81, %70, %cst_23 {dimension_numbers = #tpu.dot_dimension_numbers<[1], [0], [0], [1], [0, 0, 1, 1], [], []>} : vector<8x8xf32>, vector<8x4xf32>, vector<8x4xf32> -> vector<8x4xf32>
    %83 = vector.extract_strided_slice %5 {offsets = [0, 20], sizes = [8, 4], strides = [1, 1]} : vector<16x32xf32> to vector<8x4xf32>
    %84 = vector.extract_strided_slice %6 {offsets = [0, 20], sizes = [8, 4], strides = [1, 1]} : vector<16x32xf32> to vector<8x4xf32>
    %85 = vector.extract_strided_slice %7 {offsets = [0, 20], sizes = [8, 4], strides = [1, 1]} : vector<16x32xf32> to vector<8x4xf32>
    %cst_24 = arith.constant dense<0.000000e+00> : vector<8x8xf32>
    %86 = tpu.matmul %83, %84, %cst_24 {dimension_numbers = #tpu.dot_dimension_numbers<[1], [1], [0], [0], [0, 0, 1, 0], [], []>} : vector<8x4xf32>, vector<8x4xf32>, vector<8x8xf32> -> vector<8x8xf32>
    %cst_25 = arith.constant dense<0xFF800000> : vector<8xf32>
    %87 = vector.multi_reduction <maximumf>, %86, %cst_25 [1] : vector<8x8xf32> to vector<8xf32>
    %88 = vector.shape_cast %87 : vector<8xf32> to vector<8x1xf32>
    %89 = vector.broadcast %88 : vector<8x1xf32> to vector<8x8xf32>
    %90 = arith.subf %86, %89 : vector<8x8xf32>
    %91 = math.exp %90 : vector<8x8xf32>
    %cst_26 = arith.constant dense<0.000000e+00> : vector<8xf32>
    %92 = vector.multi_reduction <add>, %91, %cst_26 [1] : vector<8x8xf32> to vector<8xf32>
    %93 = vector.shape_cast %92 : vector<8xf32> to vector<8x1xf32>
    %94 = tpu.reciprocal %93 {approx = true} : vector<8x1xf32> -> vector<8x1xf32>
    %95 = vector.broadcast %94 : vector<8x1xf32> to vector<8x8xf32>
    %96 = arith.mulf %91, %95 : vector<8x8xf32>
    %cst_27 = arith.constant dense<0.000000e+00> : vector<8x4xf32>
    %97 = tpu.matmul %96, %85, %cst_27 {dimension_numbers = #tpu.dot_dimension_numbers<[1], [0], [0], [1], [0, 0, 1, 1], [], []>} : vector<8x8xf32>, vector<8x4xf32>, vector<8x4xf32> -> vector<8x4xf32>
    %98 = vector.extract_strided_slice %5 {offsets = [0, 24], sizes = [8, 4], strides = [1, 1]} : vector<16x32xf32> to vector<8x4xf32>
    %99 = vector.extract_strided_slice %6 {offsets = [0, 24], sizes = [8, 4], strides = [1, 1]} : vector<16x32xf32> to vector<8x4xf32>
    %100 = vector.extract_strided_slice %7 {offsets = [0, 24], sizes = [8, 4], strides = [1, 1]} : vector<16x32xf32> to vector<8x4xf32>
    %cst_28 = arith.constant dense<0.000000e+00> : vector<8x8xf32>
    %101 = tpu.matmul %98, %99, %cst_28 {dimension_numbers = #tpu.dot_dimension_numbers<[1], [1], [0], [0], [0, 0, 1, 0], [], []>} : vector<8x4xf32>, vector<8x4xf32>, vector<8x8xf32> -> vector<8x8xf32>
    %cst_29 = arith.constant dense<0xFF800000> : vector<8xf32>
    %102 = vector.multi_reduction <maximumf>, %101, %cst_29 [1] : vector<8x8xf32> to vector<8xf32>
    %103 = vector.shape_cast %102 : vector<8xf32> to vector<8x1xf32>
    %104 = vector.broadcast %103 : vector<8x1xf32> to vector<8x8xf32>
    %105 = arith.subf %101, %104 : vector<8x8xf32>
    %106 = math.exp %105 : vector<8x8xf32>
    %cst_30 = arith.constant dense<0.000000e+00> : vector<8xf32>
    %107 = vector.multi_reduction <add>, %106, %cst_30 [1] : vector<8x8xf32> to vector<8xf32>
    %108 = vector.shape_cast %107 : vector<8xf32> to vector<8x1xf32>
    %109 = tpu.reciprocal %108 {approx = true} : vector<8x1xf32> -> vector<8x1xf32>
    %110 = vector.broadcast %109 : vector<8x1xf32> to vector<8x8xf32>
    %111 = arith.mulf %106, %110 : vector<8x8xf32>
    %cst_31 = arith.constant dense<0.000000e+00> : vector<8x4xf32>
    %112 = tpu.matmul %111, %100, %cst_31 {dimension_numbers = #tpu.dot_dimension_numbers<[1], [0], [0], [1], [0, 0, 1, 1], [], []>} : vector<8x8xf32>, vector<8x4xf32>, vector<8x4xf32> -> vector<8x4xf32>
    %113 = vector.extract_strided_slice %5 {offsets = [0, 28], sizes = [8, 4], strides = [1, 1]} : vector<16x32xf32> to vector<8x4xf32>
    %114 = vector.extract_strided_slice %6 {offsets = [0, 28], sizes = [8, 4], strides = [1, 1]} : vector<16x32xf32> to vector<8x4xf32>
    %115 = vector.extract_strided_slice %7 {offsets = [0, 28], sizes = [8, 4], strides = [1, 1]} : vector<16x32xf32> to vector<8x4xf32>
    %cst_32 = arith.constant dense<0.000000e+00> : vector<8x8xf32>
    %116 = tpu.matmul %113, %114, %cst_32 {dimension_numbers = #tpu.dot_dimension_numbers<[1], [1], [0], [0], [0, 0, 1, 0], [], []>} : vector<8x4xf32>, vector<8x4xf32>, vector<8x8xf32> -> vector<8x8xf32>
    %cst_33 = arith.constant dense<0xFF800000> : vector<8xf32>
    %117 = vector.multi_reduction <maximumf>, %116, %cst_33 [1] : vector<8x8xf32> to vector<8xf32>
    %118 = vector.shape_cast %117 : vector<8xf32> to vector<8x1xf32>
    %119 = vector.broadcast %118 : vector<8x1xf32> to vector<8x8xf32>
    %120 = arith.subf %116, %119 : vector<8x8xf32>
    %121 = math.exp %120 : vector<8x8xf32>
    %cst_34 = arith.constant dense<0.000000e+00> : vector<8xf32>
    %122 = vector.multi_reduction <add>, %121, %cst_34 [1] : vector<8x8xf32> to vector<8xf32>
    %123 = vector.shape_cast %122 : vector<8xf32> to vector<8x1xf32>
    %124 = tpu.reciprocal %123 {approx = true} : vector<8x1xf32> -> vector<8x1xf32>
    %125 = vector.broadcast %124 : vector<8x1xf32> to vector<8x8xf32>
    %126 = arith.mulf %121, %125 : vector<8x8xf32>
    %cst_35 = arith.constant dense<0.000000e+00> : vector<8x4xf32>
    %127 = tpu.matmul %126, %115, %cst_35 {dimension_numbers = #tpu.dot_dimension_numbers<[1], [0], [0], [1], [0, 0, 1, 1], [], []>} : vector<8x8xf32>, vector<8x4xf32>, vector<8x4xf32> -> vector<8x4xf32>
    %128 = tpu.concatenate %22, %37, %52, %67, %82, %97, %112, %127 in 1 : vector<8x4xf32>, vector<8x4xf32>, vector<8x4xf32>, vector<8x4xf32>, vector<8x4xf32>, vector<8x4xf32>, vector<8x4xf32>, vector<8x4xf32> -> vector<8x32xf32>
    %129 = vector.extract_strided_slice %5 {offsets = [8, 0], sizes = [8, 4], strides = [1, 1]} : vector<16x32xf32> to vector<8x4xf32>
    %130 = vector.extract_strided_slice %6 {offsets = [8, 0], sizes = [8, 4], strides = [1, 1]} : vector<16x32xf32> to vector<8x4xf32>
    %131 = vector.extract_strided_slice %7 {offsets = [8, 0], sizes = [8, 4], strides = [1, 1]} : vector<16x32xf32> to vector<8x4xf32>
    %cst_36 = arith.constant dense<0.000000e+00> : vector<8x8xf32>
    %132 = tpu.matmul %129, %130, %cst_36 {dimension_numbers = #tpu.dot_dimension_numbers<[1], [1], [0], [0], [0, 0, 1, 0], [], []>} : vector<8x4xf32>, vector<8x4xf32>, vector<8x8xf32> -> vector<8x8xf32>
    %cst_37 = arith.constant dense<0xFF800000> : vector<8xf32>
    %133 = vector.multi_reduction <maximumf>, %132, %cst_37 [1] : vector<8x8xf32> to vector<8xf32>
    %134 = vector.shape_cast %133 : vector<8xf32> to vector<8x1xf32>
    %135 = vector.broadcast %134 : vector<8x1xf32> to vector<8x8xf32>
    %136 = arith.subf %132, %135 : vector<8x8xf32>
    %137 = math.exp %136 : vector<8x8xf32>
    %cst_38 = arith.constant dense<0.000000e+00> : vector<8xf32>
    %138 = vector.multi_reduction <add>, %137, %cst_38 [1] : vector<8x8xf32> to vector<8xf32>
    %139 = vector.shape_cast %138 : vector<8xf32> to vector<8x1xf32>
    %140 = tpu.reciprocal %139 {approx = true} : vector<8x1xf32> -> vector<8x1xf32>
    %141 = vector.broadcast %140 : vector<8x1xf32> to vector<8x8xf32>
    %142 = arith.mulf %137, %141 : vector<8x8xf32>
    %cst_39 = arith.constant dense<0.000000e+00> : vector<8x4xf32>
    %143 = tpu.matmul %142, %131, %cst_39 {dimension_numbers = #tpu.dot_dimension_numbers<[1], [0], [0], [1], [0, 0, 1, 1], [], []>} : vector<8x8xf32>, vector<8x4xf32>, vector<8x4xf32> -> vector<8x4xf32>
    %144 = vector.extract_strided_slice %5 {offsets = [8, 4], sizes = [8, 4], strides = [1, 1]} : vector<16x32xf32> to vector<8x4xf32>
    %145 = vector.extract_strided_slice %6 {offsets = [8, 4], sizes = [8, 4], strides = [1, 1]} : vector<16x32xf32> to vector<8x4xf32>
    %146 = vector.extract_strided_slice %7 {offsets = [8, 4], sizes = [8, 4], strides = [1, 1]} : vector<16x32xf32> to vector<8x4xf32>
    %cst_40 = arith.constant dense<0.000000e+00> : vector<8x8xf32>
    %147 = tpu.matmul %144, %145, %cst_40 {dimension_numbers = #tpu.dot_dimension_numbers<[1], [1], [0], [0], [0, 0, 1, 0], [], []>} : vector<8x4xf32>, vector<8x4xf32>, vector<8x8xf32> -> vector<8x8xf32>
    %cst_41 = arith.constant dense<0xFF800000> : vector<8xf32>
    %148 = vector.multi_reduction <maximumf>, %147, %cst_41 [1] : vector<8x8xf32> to vector<8xf32>
    %149 = vector.shape_cast %148 : vector<8xf32> to vector<8x1xf32>
    %150 = vector.broadcast %149 : vector<8x1xf32> to vector<8x8xf32>
    %151 = arith.subf %147, %150 : vector<8x8xf32>
    %152 = math.exp %151 : vector<8x8xf32>
    %cst_42 = arith.constant dense<0.000000e+00> : vector<8xf32>
    %153 = vector.multi_reduction <add>, %152, %cst_42 [1] : vector<8x8xf32> to vector<8xf32>
    %154 = vector.shape_cast %153 : vector<8xf32> to vector<8x1xf32>
    %155 = tpu.reciprocal %154 {approx = true} : vector<8x1xf32> -> vector<8x1xf32>
    %156 = vector.broadcast %155 : vector<8x1xf32> to vector<8x8xf32>
    %157 = arith.mulf %152, %156 : vector<8x8xf32>
    %cst_43 = arith.constant dense<0.000000e+00> : vector<8x4xf32>
    %158 = tpu.matmul %157, %146, %cst_43 {dimension_numbers = #tpu.dot_dimension_numbers<[1], [0], [0], [1], [0, 0, 1, 1], [], []>} : vector<8x8xf32>, vector<8x4xf32>, vector<8x4xf32> -> vector<8x4xf32>
    %159 = vector.extract_strided_slice %5 {offsets = [8, 8], sizes = [8, 4], strides = [1, 1]} : vector<16x32xf32> to vector<8x4xf32>
    %160 = vector.extract_strided_slice %6 {offsets = [8, 8], sizes = [8, 4], strides = [1, 1]} : vector<16x32xf32> to vector<8x4xf32>
    %161 = vector.extract_strided_slice %7 {offsets = [8, 8], sizes = [8, 4], strides = [1, 1]} : vector<16x32xf32> to vector<8x4xf32>
    %cst_44 = arith.constant dense<0.000000e+00> : vector<8x8xf32>
    %162 = tpu.matmul %159, %160, %cst_44 {dimension_numbers = #tpu.dot_dimension_numbers<[1], [1], [0], [0], [0, 0, 1, 0], [], []>} : vector<8x4xf32>, vector<8x4xf32>, vector<8x8xf32> -> vector<8x8xf32>
    %cst_45 = arith.constant dense<0xFF800000> : vector<8xf32>
    %163 = vector.multi_reduction <maximumf>, %162, %cst_45 [1] : vector<8x8xf32> to vector<8xf32>
    %164 = vector.shape_cast %163 : vector<8xf32> to vector<8x1xf32>
    %165 = vector.broadcast %164 : vector<8x1xf32> to vector<8x8xf32>
    %166 = arith.subf %162, %165 : vector<8x8xf32>
    %167 = math.exp %166 : vector<8x8xf32>
    %cst_46 = arith.constant dense<0.000000e+00> : vector<8xf32>
    %168 = vector.multi_reduction <add>, %167, %cst_46 [1] : vector<8x8xf32> to vector<8xf32>
    %169 = vector.shape_cast %168 : vector<8xf32> to vector<8x1xf32>
    %170 = tpu.reciprocal %169 {approx = true} : vector<8x1xf32> -> vector<8x1xf32>
    %171 = vector.broadcast %170 : vector<8x1xf32> to vector<8x8xf32>
    %172 = arith.mulf %167, %171 : vector<8x8xf32>
    %cst_47 = arith.constant dense<0.000000e+00> : vector<8x4xf32>
    %173 = tpu.matmul %172, %161, %cst_47 {dimension_numbers = #tpu.dot_dimension_numbers<[1], [0], [0], [1], [0, 0, 1, 1], [], []>} : vector<8x8xf32>, vector<8x4xf32>, vector<8x4xf32> -> vector<8x4xf32>
    %174 = vector.extract_strided_slice %5 {offsets = [8, 12], sizes = [8, 4], strides = [1, 1]} : vector<16x32xf32> to vector<8x4xf32>
    %175 = vector.extract_strided_slice %6 {offsets = [8, 12], sizes = [8, 4], strides = [1, 1]} : vector<16x32xf32> to vector<8x4xf32>
    %176 = vector.extract_strided_slice %7 {offsets = [8, 12], sizes = [8, 4], strides = [1, 1]} : vector<16x32xf32> to vector<8x4xf32>
    %cst_48 = arith.constant dense<0.000000e+00> : vector<8x8xf32>
    %177 = tpu.matmul %174, %175, %cst_48 {dimension_numbers = #tpu.dot_dimension_numbers<[1], [1], [0], [0], [0, 0, 1, 0], [], []>} : vector<8x4xf32>, vector<8x4xf32>, vector<8x8xf32> -> vector<8x8xf32>
    %cst_49 = arith.constant dense<0xFF800000> : vector<8xf32>
    %178 = vector.multi_reduction <maximumf>, %177, %cst_49 [1] : vector<8x8xf32> to vector<8xf32>
    %179 = vector.shape_cast %178 : vector<8xf32> to vector<8x1xf32>
    %180 = vector.broadcast %179 : vector<8x1xf32> to vector<8x8xf32>
    %181 = arith.subf %177, %180 : vector<8x8xf32>
    %182 = math.exp %181 : vector<8x8xf32>
    %cst_50 = arith.constant dense<0.000000e+00> : vector<8xf32>
    %183 = vector.multi_reduction <add>, %182, %cst_50 [1] : vector<8x8xf32> to vector<8xf32>
    %184 = vector.shape_cast %183 : vector<8xf32> to vector<8x1xf32>
    %185 = tpu.reciprocal %184 {approx = true} : vector<8x1xf32> -> vector<8x1xf32>
    %186 = vector.broadcast %185 : vector<8x1xf32> to vector<8x8xf32>
    %187 = arith.mulf %182, %186 : vector<8x8xf32>
    %cst_51 = arith.constant dense<0.000000e+00> : vector<8x4xf32>
    %188 = tpu.matmul %187, %176, %cst_51 {dimension_numbers = #tpu.dot_dimension_numbers<[1], [0], [0], [1], [0, 0, 1, 1], [], []>} : vector<8x8xf32>, vector<8x4xf32>, vector<8x4xf32> -> vector<8x4xf32>
    %189 = vector.extract_strided_slice %5 {offsets = [8, 16], sizes = [8, 4], strides = [1, 1]} : vector<16x32xf32> to vector<8x4xf32>
    %190 = vector.extract_strided_slice %6 {offsets = [8, 16], sizes = [8, 4], strides = [1, 1]} : vector<16x32xf32> to vector<8x4xf32>
    %191 = vector.extract_strided_slice %7 {offsets = [8, 16], sizes = [8, 4], strides = [1, 1]} : vector<16x32xf32> to vector<8x4xf32>
    %cst_52 = arith.constant dense<0.000000e+00> : vector<8x8xf32>
    %192 = tpu.matmul %189, %190, %cst_52 {dimension_numbers = #tpu.dot_dimension_numbers<[1], [1], [0], [0], [0, 0, 1, 0], [], []>} : vector<8x4xf32>, vector<8x4xf32>, vector<8x8xf32> -> vector<8x8xf32>
    %cst_53 = arith.constant dense<0xFF800000> : vector<8xf32>
    %193 = vector.multi_reduction <maximumf>, %192, %cst_53 [1] : vector<8x8xf32> to vector<8xf32>
    %194 = vector.shape_cast %193 : vector<8xf32> to vector<8x1xf32>
    %195 = vector.broadcast %194 : vector<8x1xf32> to vector<8x8xf32>
    %196 = arith.subf %192, %195 : vector<8x8xf32>
    %197 = math.exp %196 : vector<8x8xf32>
    %cst_54 = arith.constant dense<0.000000e+00> : vector<8xf32>
    %198 = vector.multi_reduction <add>, %197, %cst_54 [1] : vector<8x8xf32> to vector<8xf32>
    %199 = vector.shape_cast %198 : vector<8xf32> to vector<8x1xf32>
    %200 = tpu.reciprocal %199 {approx = true} : vector<8x1xf32> -> vector<8x1xf32>
    %201 = vector.broadcast %200 : vector<8x1xf32> to vector<8x8xf32>
    %202 = arith.mulf %197, %201 : vector<8x8xf32>
    %cst_55 = arith.constant dense<0.000000e+00> : vector<8x4xf32>
    %203 = tpu.matmul %202, %191, %cst_55 {dimension_numbers = #tpu.dot_dimension_numbers<[1], [0], [0], [1], [0, 0, 1, 1], [], []>} : vector<8x8xf32>, vector<8x4xf32>, vector<8x4xf32> -> vector<8x4xf32>
    %204 = vector.extract_strided_slice %5 {offsets = [8, 20], sizes = [8, 4], strides = [1, 1]} : vector<16x32xf32> to vector<8x4xf32>
    %205 = vector.extract_strided_slice %6 {offsets = [8, 20], sizes = [8, 4], strides = [1, 1]} : vector<16x32xf32> to vector<8x4xf32>
    %206 = vector.extract_strided_slice %7 {offsets = [8, 20], sizes = [8, 4], strides = [1, 1]} : vector<16x32xf32> to vector<8x4xf32>
    %cst_56 = arith.constant dense<0.000000e+00> : vector<8x8xf32>
    %207 = tpu.matmul %204, %205, %cst_56 {dimension_numbers = #tpu.dot_dimension_numbers<[1], [1], [0], [0], [0, 0, 1, 0], [], []>} : vector<8x4xf32>, vector<8x4xf32>, vector<8x8xf32> -> vector<8x8xf32>
    %cst_57 = arith.constant dense<0xFF800000> : vector<8xf32>
    %208 = vector.multi_reduction <maximumf>, %207, %cst_57 [1] : vector<8x8xf32> to vector<8xf32>
    %209 = vector.shape_cast %208 : vector<8xf32> to vector<8x1xf32>
    %210 = vector.broadcast %209 : vector<8x1xf32> to vector<8x8xf32>
    %211 = arith.subf %207, %210 : vector<8x8xf32>
    %212 = math.exp %211 : vector<8x8xf32>
    %cst_58 = arith.constant dense<0.000000e+00> : vector<8xf32>
    %213 = vector.multi_reduction <add>, %212, %cst_58 [1] : vector<8x8xf32> to vector<8xf32>
    %214 = vector.shape_cast %213 : vector<8xf32> to vector<8x1xf32>
    %215 = tpu.reciprocal %214 {approx = true} : vector<8x1xf32> -> vector<8x1xf32>
    %216 = vector.broadcast %215 : vector<8x1xf32> to vector<8x8xf32>
    %217 = arith.mulf %212, %216 : vector<8x8xf32>
    %cst_59 = arith.constant dense<0.000000e+00> : vector<8x4xf32>
    %218 = tpu.matmul %217, %206, %cst_59 {dimension_numbers = #tpu.dot_dimension_numbers<[1], [0], [0], [1], [0, 0, 1, 1], [], []>} : vector<8x8xf32>, vector<8x4xf32>, vector<8x4xf32> -> vector<8x4xf32>
    %219 = vector.extract_strided_slice %5 {offsets = [8, 24], sizes = [8, 4], strides = [1, 1]} : vector<16x32xf32> to vector<8x4xf32>
    %220 = vector.extract_strided_slice %6 {offsets = [8, 24], sizes = [8, 4], strides = [1, 1]} : vector<16x32xf32> to vector<8x4xf32>
    %221 = vector.extract_strided_slice %7 {offsets = [8, 24], sizes = [8, 4], strides = [1, 1]} : vector<16x32xf32> to vector<8x4xf32>
    %cst_60 = arith.constant dense<0.000000e+00> : vector<8x8xf32>
    %222 = tpu.matmul %219, %220, %cst_60 {dimension_numbers = #tpu.dot_dimension_numbers<[1], [1], [0], [0], [0, 0, 1, 0], [], []>} : vector<8x4xf32>, vector<8x4xf32>, vector<8x8xf32> -> vector<8x8xf32>
    %cst_61 = arith.constant dense<0xFF800000> : vector<8xf32>
    %223 = vector.multi_reduction <maximumf>, %222, %cst_61 [1] : vector<8x8xf32> to vector<8xf32>
    %224 = vector.shape_cast %223 : vector<8xf32> to vector<8x1xf32>
    %225 = vector.broadcast %224 : vector<8x1xf32> to vector<8x8xf32>
    %226 = arith.subf %222, %225 : vector<8x8xf32>
    %227 = math.exp %226 : vector<8x8xf32>
    %cst_62 = arith.constant dense<0.000000e+00> : vector<8xf32>
    %228 = vector.multi_reduction <add>, %227, %cst_62 [1] : vector<8x8xf32> to vector<8xf32>
    %229 = vector.shape_cast %228 : vector<8xf32> to vector<8x1xf32>
    %230 = tpu.reciprocal %229 {approx = true} : vector<8x1xf32> -> vector<8x1xf32>
    %231 = vector.broadcast %230 : vector<8x1xf32> to vector<8x8xf32>
    %232 = arith.mulf %227, %231 : vector<8x8xf32>
    %cst_63 = arith.constant dense<0.000000e+00> : vector<8x4xf32>
    %233 = tpu.matmul %232, %221, %cst_63 {dimension_numbers = #tpu.dot_dimension_numbers<[1], [0], [0], [1], [0, 0, 1, 1], [], []>} : vector<8x8xf32>, vector<8x4xf32>, vector<8x4xf32> -> vector<8x4xf32>
    %234 = vector.extract_strided_slice %5 {offsets = [8, 28], sizes = [8, 4], strides = [1, 1]} : vector<16x32xf32> to vector<8x4xf32>
    %235 = vector.extract_strided_slice %6 {offsets = [8, 28], sizes = [8, 4], strides = [1, 1]} : vector<16x32xf32> to vector<8x4xf32>
    %236 = vector.extract_strided_slice %7 {offsets = [8, 28], sizes = [8, 4], strides = [1, 1]} : vector<16x32xf32> to vector<8x4xf32>
    %cst_64 = arith.constant dense<0.000000e+00> : vector<8x8xf32>
    %237 = tpu.matmul %234, %235, %cst_64 {dimension_numbers = #tpu.dot_dimension_numbers<[1], [1], [0], [0], [0, 0, 1, 0], [], []>} : vector<8x4xf32>, vector<8x4xf32>, vector<8x8xf32> -> vector<8x8xf32>
    %cst_65 = arith.constant dense<0xFF800000> : vector<8xf32>
    %238 = vector.multi_reduction <maximumf>, %237, %cst_65 [1] : vector<8x8xf32> to vector<8xf32>
    %239 = vector.shape_cast %238 : vector<8xf32> to vector<8x1xf32>
    %240 = vector.broadcast %239 : vector<8x1xf32> to vector<8x8xf32>
    %241 = arith.subf %237, %240 : vector<8x8xf32>
    %242 = math.exp %241 : vector<8x8xf32>
    %cst_66 = arith.constant dense<0.000000e+00> : vector<8xf32>
    %243 = vector.multi_reduction <add>, %242, %cst_66 [1] : vector<8x8xf32> to vector<8xf32>
    %244 = vector.shape_cast %243 : vector<8xf32> to vector<8x1xf32>
    %245 = tpu.reciprocal %244 {approx = true} : vector<8x1xf32> -> vector<8x1xf32>
    %246 = vector.broadcast %245 : vector<8x1xf32> to vector<8x8xf32>
    %247 = arith.mulf %242, %246 : vector<8x8xf32>
    %cst_67 = arith.constant dense<0.000000e+00> : vector<8x4xf32>
    %248 = tpu.matmul %247, %236, %cst_67 {dimension_numbers = #tpu.dot_dimension_numbers<[1], [0], [0], [1], [0, 0, 1, 1], [], []>} : vector<8x8xf32>, vector<8x4xf32>, vector<8x4xf32> -> vector<8x4xf32>
    %249 = tpu.concatenate %143, %158, %173, %188, %203, %218, %233, %248 in 1 : vector<8x4xf32>, vector<8x4xf32>, vector<8x4xf32>, vector<8x4xf32>, vector<8x4xf32>, vector<8x4xf32>, vector<8x4xf32>, vector<8x4xf32> -> vector<8x32xf32>
    %250 = tpu.concatenate %128, %249 in 0 : vector<8x32xf32>, vector<8x32xf32> -> vector<16x32xf32>
    %c0_68 = arith.constant 0 : index
    %c0_69 = arith.constant 0 : index
    %251 = vector.load %arg3[%c0_68, %c0_69] : memref<32x32xf32, #tpu.memory_space<vmem>>, vector<32x32xf32>
    %cst_70 = arith.constant dense<0.000000e+00> : vector<16x32xf32>
    %252 = tpu.matmul %250, %251, %cst_70 {dimension_numbers = #tpu.dot_dimension_numbers<[1], [0], [0], [1], [0, 0, 1, 1], [], []>} : vector<16x32xf32>, vector<32x32xf32>, vector<16x32xf32> -> vector<16x32xf32>
    %c0_71 = arith.constant 0 : index
    %c0_72 = arith.constant 0 : index
    %253 = vector.load %arg4[%c0_71, %c0_72] : memref<1x32xf32, #tpu.memory_space<vmem>>, vector<1x32xf32>
    %254 = vector.broadcast %253 : vector<1x32xf32> to vector<16x32xf32>
    %255 = arith.addf %252, %254 : vector<16x32xf32>
    %c0_73 = arith.constant 0 : index
    %c0_74 = arith.constant 0 : index
    %256 = vector.load %arg5[%c0_73, %c0_74] : memref<16x32xf32, #tpu.memory_space<vmem>>, vector<16x32xf32>
    tpu.vector_store %arg5[%c0_73, %c0_74], %255 {strides = array<i32>} : memref<16x32xf32, #tpu.memory_space<vmem>>, vector<16x32xf32>,
    return
  }
  func.func @transform_0(%arg0: i32) -> (i32, i32) {
    %c0_i32 = arith.constant 0 : i32
    %c0_i32_0 = arith.constant 0 : i32
    return %arg0, %c0_i32 : i32, i32
  }
  func.func @transform_1(%arg0: i32) -> (i32, i32) {
    %c0_i32 = arith.constant 0 : i32
    %c0_i32_0 = arith.constant 0 : i32
    %c0_i32_1 = arith.constant 0 : i32
    return %c0_i32, %c0_i32_0 : i32, i32
  }
  func.func @transform_2(%arg0: i32) -> (i32, i32) {
    %c0_i32 = arith.constant 0 : i32
    %c0_i32_0 = arith.constant 0 : i32
    %c0_i32_1 = arith.constant 0 : i32
    return %c0_i32, %c0_i32_0 : i32, i32
  }
  func.func @transform_3(%arg0: i32) -> (i32, i32) {
    %c0_i32 = arith.constant 0 : i32
    %c0_i32_0 = arith.constant 0 : i32
    %c0_i32_1 = arith.constant 0 : i32
    return %c0_i32, %c0_i32_0 : i32, i32
  }
  func.func @transform_4(%arg0: i32) -> (i32, i32) {
    %c0_i32 = arith.constant 0 : i32
    %c0_i32_0 = arith.constant 0 : i32
    return %arg0, %c0_i32 : i32, i32
  }
}

</mosaic_0001>

<bundles_post_ra>
// kernel: tpu_custom_call.1
= control target key start
LH: loop header
LB: loop body
LE: loop exit
PB: predicated region body
PF: predicated region fallthrough
CT: control target
= control target key end

     0   :  { %9 = vsyncpa [#allocation3], 0  ;;  %s3996_s0 = inlined_call_operand.hbm [shape: f32[16,32], index: 0, kind: input, shape index: {}]   ;;  %s3997_s1 = inlined_call_operand.hbm [shape: f32[32,96], index: 1, kind: input, shape index: {}]   ;;  %s3998_s2 = inlined_call_operand.hbm [shape: f32[32,32], index: 2, kind: input, shape index: {}]   ;;  %s3999_s3 = inlined_call_operand.vmem [shape: f32[1,32], index: 3, kind: input, shape index: {}]   ;;  %s4000_s4 = inlined_call_operand.hbm [shape: f32[16,32], index: 4, kind: output, shape index: {}]  }
   0x1   :  { %10 = vsyncpa [#allocation6], 0 }
   0x2   :  { %11 = vsyncpa [#allocation4], 0  ;;  %s3476_s15 = smov [#allocation5]   ;;  %s3477_s17 = smov [#allocation2]  }
   0x3   :  { %s29_s16 = sshll.u32 %s3476_s15, 4  ;;  %s17_s18 = sshll.u32 %s3477_s17, 4  ;;  %s30_s16 = int_to_ptr.vmem [resolvable:$true] %s29_s16  ;;  %s18_s18 = int_to_ptr.vmem [resolvable:$true] %s17_s18 }
   0x4   :  { %s3398_s19 = scalar_lea.vmem %s30_s16, 512  ;;  %p3403_p1 = scmp.lt.s32.totalorder %s30_s16, %s30_s16 }
   0x5   :  { %p3399_p0 = scmp.ne.s32.totalorder %s30_s16, %s3398_s19  ;;  %p3404_p2 = scmp.lt.s32.totalorder %s3398_s19, %s3398_s19 }
   0x7   :  { %p3405_p3 = por %p3404_p2, %p3403_p1 }
   0x9   :  { %p3406_p4 = pnand %p3405_p3, %p3399_p0 }
   0xb   :  { %3409 = shalt.err (!%p3406_p4)
}
   0xc   :  { %s3478_s20 = smov 128   ;;  %s3479_s21 = smov 8  }
   0xd   :  { %35 = dma.hbm_to_vmem [thread:$0]  %s3997_s1, 512, %s30_s16, [#allocation6], %s3478_s20, %s3478_s20, %s3479_s21  }
   0xe   :  { %s3418_s24 = scalar_lea.vmem %s18_s18, 256  ;;  %p3423_p6 = scmp.lt.s32.totalorder %s18_s18, %s18_s18 }
   0xf   :  { %p3419_p5 = scmp.ne.s32.totalorder %s18_s18, %s3418_s24  ;;  %p3424_p7 = scmp.lt.s32.totalorder %s3418_s24, %s3418_s24 }
  0x11   :  { %p3425_p8 = por %p3424_p7, %p3423_p6 }
  0x13   :  { %p3426_p9 = pnand %p3425_p8, %p3419_p5 }
  0x15   :  { %3429 = shalt.err (!%p3426_p9)
}
  0x16   :  { %23 = dma.hbm_to_vmem [thread:$0]  %s3996_s0, 256, %s18_s18, [#allocation3], %s3478_s20, %s3478_s20, %s3479_s21  }
  0x17   :  { %s3480_s27 = smov [#allocation7]  }
  0x18   :  { %s41_s28 = sshll.u32 %s3480_s27, 4  ;;  %s42_s28 = int_to_ptr.vmem [resolvable:$true] %s41_s28 }
  0x19   :  { %s3438_s29 = scalar_lea.vmem %s42_s28, 512  ;;  %p3443_p11 = scmp.lt.s32.totalorder %s42_s28, %s42_s28 }
  0x1a   :  { %p3439_p10 = scmp.ne.s32.totalorder %s42_s28, %s3438_s29  ;;  %p3444_p12 = scmp.lt.s32.totalorder %s3438_s29, %s3438_s29 }
  0x1c   :  { %p3445_p13 = por %p3444_p12, %p3443_p11 }
  0x1e   :  { %p3446_p0 = pnand %p3445_p13, %p3439_p10 }
  0x20   :  { %3449 = shalt.err (!%p3446_p0)
}
  0x21   :  { %47 = dma.hbm_to_vmem [thread:$0]  %s3998_s2, 512, %s42_s28, [#allocation6], %s3478_s20, %s3478_s20, %s3479_s21  }
  0x22   :  { %3470 = dma.done.wait [#allocation3], 256  }
  0x23   :  { %3471 = vsyncadd [#allocation3], 4294967040 }
  0x24   :  { %3472 = dma.done.wait [#allocation6], 1024  }
  0x25   :  { %3473 = vsyncadd [#allocation6], 4294966272  ;;  %vm65_vm0 = vcmask 261120   ;;  %v64_v0 = vld [vmem:[#allocation5 + $0x18] sm:$0xff]  ;;  %v63_v1 = vld [vmem:[#allocation5 + $0x10] sm:$0xff]  ;;  %v3481_v6 = vmov 0.0  }
  0x26   :  { %3107 = vmatprep.subr.mxu0 %v64_v0  ;;  %v59_v2 = vld [vmem:[#allocation2] sm:$0xff]  ;;  %v62_v3 = vld [vmem:[#allocation5 + $0x8] sm:$0xff]  ;;  %v61_v4 = vld [vmem:[#allocation5] sm:$0xff]  ;;  %3118 = vmatprep.subr.mxu1 %v3481_v6  ;;  %vm3482_vm1 = vmmov 0   ;;  %s3483_s0 = smov 64   ;;  %s3484_s2 = smov 96  }
  0x27   :  { %3108 = vmatpush3.msra.mxu0 %v64_v0  ;;  %3115 = vmatprep.mubr.msk.f32.mxu0 %vm65_vm0, %v59_v2  ;;  %v60_v5 = vld [vmem:[#allocation2 + $0x8] sm:$0xff]  ;;  %s3485_s5 = smov 92   ;;  %s3486_s6 = smov 124   ;;  %vm152_vm2 = vcmask 31744   ;;  %vm228_vm3 = vcmask 64512   ;;  %vm1501_vm4 = vcmask 97280  }
  0x28   :  { %3109 = vmatprep.subr.mxu0 %v63_v1  ;;  %3120 = vmatprep.mubr.msk.f32.mxu1 %vm3482_vm1, %v3481_v6  ;;  %s3487_s7 = smov 88   ;;  %s3488_s8 = smov 120   ;;  %vm1503_vm5 = vcmask 130048   ;;  %vm1505_vm6 = vcmask 162816   ;;  %vm1507_vm7 = vcmask 195584   ;;  %vm1509_vm8 = vcmask 228352  }
  0x29   :  { %3110 = vmatpush3.msra.mxu0 %v63_v1  ;;  %s3489_s9 = smov 116   ;;  %s3490_s10 = smov 84  }
  0x2a   :  { %3111 = vmatprep.subr.mxu0 %v62_v3  ;;  %s3491_s11 = smov 72   ;;  %s3492_s12 = smov 68  }
  0x2b   :  { %3112 = vmatpush3.msra.mxu0 %v62_v3  ;;  %s3493_s13 = smov 112   ;;  %s3494_s14 = smov 108  }
  0x2c   :  { %3113 = vmatprep.subr.mxu0 %v61_v4  ;;  %s3495_s15 = smov 104   ;;  %s3496_s16 = smov 100  }
  0x2d   :  { %3114 = vmatpush3.msra.mxu0 %v61_v4  ;;  %s3497_s17 = smov 80   ;;  %s3498_s18 = smov 76  }
  0x2e   :  { %3116 = vmatmul.mubr.msk.f32.vlgmr.msra.gmra.mxu0 %vm65_vm0, %v60_v5  ;;  %3138 = vmatprep.subr.mxu0 %v3481_v6  ;;  %s3499_s19 = smov 56   ;;  %s3500_s22 = smov 52  }
  0x2f   :  { %3140 = vmatprep.mubr.msk.f32.mxu0 %vm3482_vm1, %v3481_v6  ;;  %s3501_s23 = smov 60   ;;  %s3502_s24 = smov 48  }
  0x30   :  { %s3503_s25 = smov 44   ;;  %s3504_s26 = smov 36  }
  0x31   :  { %s3505_s27 = smov 40   ;;  %s3506_s28 = smov 4  }
  0x32   :  { %s3507_s29 = smov 12   ;;  %s3508_s1 = smov 16  }
  0x33   :  { %s3509_s30 = smov 20  }
  0xee   :  { %v3564_v7 = vpop.f32.mrf.mxu0 }
  0xef   :  { %v3613_v21 = vmul.f32 0.5, %v3564_v7 }
  0xf0   :  { %v3566_v8 = vpop.f32.mrf.mxu0 }
  0xf1   :  { %240 = vrot.lane.b32.xlu1 %v3566_v8, %s3483_s0  ;;  %150 = vrot.lane.b32.xlu0 %v3566_v8, %s3484_s2  ;;  %v3575_v9 = vmul.f32 0.5, %v3566_v8 }
  0xf5   :  { %318 = vrot.lane.b32.xlu1 %v3566_v8, %s3485_s5 }
  0xf9   :  { %316 = vrot.lane.b32.xlu1 %v3575_v9, %s3486_s6 }
  0xfd   :  { %483 = vrot.lane.b32.xlu1 %v3566_v8, %s3487_s7 }
 0x101   :  { %481 = vrot.lane.b32.xlu1 %v3575_v9, %s3488_s8 }
 0x105   :  { %646 = vrot.lane.b32.xlu1 %v3575_v9, %s3489_s9 }
 0x163   :  { %v241_v10 = vpop.permute.xlu1 %240  ;;  %v151_v11 = vpop.permute.xlu0 %150 }
 0x164   :  { %3119 = vmatpush3.xpose.msk.msra.mxu1 %vm152_vm2, %v151_v11 }
 0x165   :  { %3123 = vmatprep.subr.mxu1 %v3481_v6 }
 0x167   :  { %v3587_v12 = vpop.permute.xlu1 %318  ;;  %3121 = vmatmul.mubr.msk.f32.vlgmr.msra.gmra.mxu1 %vm152_vm2, %v3575_v9 }
 0x168   :  { %3124 = vmatpush3.msra.mxu1 %v241_v10  ;;  %3125 = vmatprep.mubr.msk.f32.mxu1 %vm3482_vm1, %v3481_v6 }
 0x169   :  { %3128 = vmatprep.subr.mxu1 %v3481_v6 }
 0x16b   :  { %v3594_v13 = vpop.permute.xlu1 %316 }
 0x16f   :  { %v484_v14 = vpop.permute.xlu1 %483 }
 0x170   :  { %3139 = vmatpush3.xpose.msk.msra.mxu0 %vm152_vm2, %v484_v14 }
 0x171   :  { %3148 = vmatprep.subr.mxu0 %v3481_v6 }
 0x173   :  { %v482_v15 = vpop.permute.xlu1 %481 }
 0x174   :  { %3141 = vmatmul.mubr.msk.f32.vlgmr.msra.gmra.mxu0 %vm152_vm2, %v482_v15 }
 0x175   :  { %3150 = vmatprep.mubr.msk.f32.mxu0 %vm3482_vm1, %v3481_v6 }
 0x177   :  { %v647_v27 = vpop.permute.xlu1 %646 }
 0x227   :  { %v224_v16 = vpop.f32.mrf.mxu1 }
 0x228   :  { %v229_v17 = vsel %vm228_vm3, %v224_v16, -inf }
 0x229   :  { %230 = vmax.xlane.f32.xlu0 %v229_v17  ;;  %v3122_v18 = vpop.f32.mrf.mxu1 }
 0x234   :  { %v3602_v19 = vpop.f32.mrf.mxu0 }
 0x235   :  { %v559_v22 = vsel %vm228_vm3, %v3602_v19, -inf }
 0x236   :  { %v3142_v20 = vpop.f32.mrf.mxu0 }
 0x23f   :  { %648 = vrot.lane.b32.xlu0 %v3566_v8, %s3490_s10 }
 0x243   :  { %1143 = vrot.lane.b32.xlu0 %v3566_v8, %s3491_s11 }
 0x247   :  { %1308 = vrot.lane.b32.xlu0 %v3566_v8, %s3492_s12 }
 0x24b   :  { %1512 = vrot.lane.b32.xlu0 %v3564_v7, %s3484_s2  ;;  %s3511_s2 = smov 28  }
 0x24f   :  { %1676 = vrot.lane.b32.xlu0 %v3613_v21, %s3486_s6 }
 0x253   :  { %1841 = vrot.lane.b32.xlu0 %v3613_v21, %s3488_s8 }
 0x257   :  { %2006 = vrot.lane.b32.xlu0 %v3613_v21, %s3489_s9 }
 0x25b   :  { %2171 = vrot.lane.b32.xlu0 %v3613_v21, %s3493_s13 }
 0x25f   :  { %2336 = vrot.lane.b32.xlu0 %v3613_v21, %s3494_s14 }
 0x263   :  { %2501 = vrot.lane.b32.xlu0 %v3613_v21, %s3495_s15 }
 0x267   :  { %2666 = vrot.lane.b32.xlu0 %v3613_v21, %s3496_s16 }
 0x286   :  { %560 = vmax.xlane.f32.xlu0 %v559_v22 }
 0x2b2   :  { %v231_v23 = vpop.xlane.xlu0 %230 }
 0x2b3   :  { %v232_v24 = vsub.f32 %v224_v16, %v231_v23 }
 0x2b5   :  { %v233_v25 = vmul.f32 1.442695, %v232_v24 }
 0x2b6   :  { %v649_v26 = vpop.permute.xlu0 %648 }
 0x2b7   :  { %3326 = vpow2.f32 %v233_v25  ;;  %3149 = vmatpush3.xpose.msk.msra.mxu0 %vm152_vm2, %v649_v26 }
 0x2b8   :  { %3158 = vmatprep.subr.mxu0 %v3481_v6 }
 0x2ba   :  { %3151 = vmatmul.mubr.msk.f32.vlgmr.msra.gmra.mxu0 %vm152_vm2, %v647_v27  ;;  %v1144_v31 = vpop.permute.xlu0 %1143 }
 0x2bb   :  { %3160 = vmatprep.mubr.msk.f32.mxu0 %vm3482_vm1, %v3481_v6 }
 0x2be   :  { %v1309_v33 = vpop.permute.xlu0 %1308 }
 0x2c2   :  { %v1513_v37 = vpop.permute.xlu0 %1512 }
 0x2c4   :  { %v3327_v28 = vpop.eup %3326 }
 0x2c5   :  { %v235_v29 = vsel %vm228_vm3, %v3327_v28, 0.0 }
 0x2c6   :  { %236 = vadd.xlane.f32.xlu1 %v235_v29  ;;  %v1677_v40 = vpop.permute.xlu0 %1676 }
 0x2ca   :  { %v1842_v43 = vpop.permute.xlu0 %1841 }
 0x2ce   :  { %v2007_v45 = vpop.permute.xlu0 %2006 }
 0x2d2   :  { %v2172_v48 = vpop.permute.xlu0 %2171 }
 0x2d6   :  { %v2337_v51 = vpop.permute.xlu0 %2336 }
 0x2d7   :  { %813 = vrot.lane.b32.xlu1 %v3566_v8, %s3497_s17 }
 0x2da   :  { %v2502_v56 = vpop.permute.xlu0 %2501 }
 0x2db   :  { %811 = vrot.lane.b32.xlu1 %v3575_v9, %s3493_s13 }
 0x2de   :  { %v2667_v58 = vpop.permute.xlu0 %2666 }
 0x2df   :  { %978 = vrot.lane.b32.xlu1 %v3566_v8, %s3498_s18 }
 0x2e3   :  { %976 = vrot.lane.b32.xlu1 %v3575_v9, %s3494_s14 }
 0x2e7   :  { %1141 = vrot.lane.b32.xlu1 %v3575_v9, %s3495_s15 }
 0x2eb   :  { %1306 = vrot.lane.b32.xlu1 %v3575_v9, %s3496_s16 }
 0x2ef   :  { %1678 = vrot.lane.b32.xlu1 %v3564_v7, %s3485_s5 }
 0x2f3   :  { %1843 = vrot.lane.b32.xlu1 %v3564_v7, %s3487_s7  ;;  %s3512_s7 = smov [#allocation8]  }
 0x2f4   :  { %s2965_s8 = sshll.u32 %s3512_s7, 4  ;;  %s2966_s8 = int_to_ptr.vmem [resolvable:$true] %s2965_s8 }
 0x2f5   :  { %s3450_s9 = scalar_lea.vmem %s2966_s8, 256  ;;  %p3455_p2 = scmp.lt.s32.totalorder %s2966_s8, %s2966_s8 }
 0x2f6   :  { %p3451_p1 = scmp.ne.s32.totalorder %s2966_s8, %s3450_s9  ;;  %p3456_p3 = scmp.lt.s32.totalorder %s3450_s9, %s3450_s9 }
 0x2f7   :  { %2008 = vrot.lane.b32.xlu1 %v3564_v7, %s3490_s10 }
 0x2f8   :  { %p3457_p4 = por %p3456_p3, %p3455_p2 }
 0x2fa   :  { %p3458_p5 = pnand %p3457_p4, %p3451_p1 }
 0x2fb   :  { %2173 = vrot.lane.b32.xlu1 %v3564_v7, %s3497_s17 }
 0x2ff   :  { %2338 = vrot.lane.b32.xlu1 %v3564_v7, %s3498_s18 }
 0x303   :  { %2503 = vrot.lane.b32.xlu1 %v3564_v7, %s3491_s11 }
 0x307   :  { %2668 = vrot.lane.b32.xlu1 %v3564_v7, %s3492_s12 }
 0x34f   :  { %v237_v30 = vpop.xlane.xlu1 %236 }
 0x350   :  { %3328 = vrcp.f32 %v237_v30 }
 0x353   :  { %v814_v32 = vpop.permute.xlu1 %813 }
 0x354   :  { %3159 = vmatpush3.xpose.msk.msra.mxu0 %vm152_vm2, %v814_v32 }
 0x355   :  { %3168 = vmatprep.subr.mxu0 %v3481_v6 }
 0x357   :  { %v812_v34 = vpop.permute.xlu1 %811 }
 0x358   :  { %3161 = vmatmul.mubr.msk.f32.vlgmr.msra.gmra.mxu0 %vm152_vm2, %v812_v34 }
 0x359   :  { %3170 = vmatprep.mubr.msk.f32.mxu0 %vm3482_vm1, %v3481_v6 }
 0x35b   :  { %v979_v35 = vpop.permute.xlu1 %978 }
 0x35c   :  { %3169 = vmatpush3.xpose.msk.msra.mxu0 %vm152_vm2, %v979_v35 }
 0x35d   :  { %v3329_v36 = vpop.eup %3328  ;;  %3178 = vmatprep.subr.mxu0 %v3481_v6 }
 0x35e   :  { %v239_v38 = vmul.f32 %v3329_v36, %v3327_v28 }
 0x35f   :  { %v977_v39 = vpop.permute.xlu1 %976 }
 0x360   :  { %3126 = vmatmul.mubr.msk.f32.vlgmr.msra.gmra.mxu1 %vm228_vm3, %v239_v38  ;;  %3171 = vmatmul.mubr.msk.f32.vlgmr.msra.gmra.mxu0 %vm152_vm2, %v977_v39  ;;  %v561_v39 = vpop.xlane.xlu0 %560 }
 0x361   :  { %3129 = vmatpush3.xpose.msk.msra.mxu1 %vm152_vm2, %v3587_v12  ;;  %3179 = vmatpush3.xpose.msk.msra.mxu0 %vm152_vm2, %v1144_v31 }
 0x362   :  { %3130 = vmatprep.mubr.msk.f32.mxu1 %vm3482_vm1, %v3481_v6  ;;  %3180 = vmatprep.mubr.msk.f32.mxu0 %vm3482_vm1, %v3481_v6 }
 0x363   :  { %v1142_v41 = vpop.permute.xlu1 %1141  ;;  %3188 = vmatprep.subr.mxu0 %v3481_v6  ;;  %3133 = vmatprep.subr.mxu1 %v3481_v6 }
 0x364   :  { %3131 = vmatmul.mubr.msk.f32.vlgmr.msra.gmra.mxu1 %vm152_vm2, %v3594_v13  ;;  %3181 = vmatmul.mubr.msk.f32.vlgmr.msra.gmra.mxu0 %vm152_vm2, %v1142_v41 }
 0x365   :  { %3189 = vmatpush3.xpose.msk.msra.mxu0 %vm152_vm2, %v1309_v33  ;;  %3190 = vmatprep.mubr.msk.f32.mxu0 %vm3482_vm1, %v3481_v6 }
 0x366   :  { %3198 = vmatprep.subr.mxu0 %v3481_v6  ;;  %3135 = vmatprep.mubr.msk.f32.mxu1 %vm3482_vm1, %v3481_v6 }
 0x367   :  { %v1307_v42 = vpop.permute.xlu1 %1306 }
 0x368   :  { %3191 = vmatmul.mubr.msk.f32.vlgmr.msra.gmra.mxu0 %vm152_vm2, %v1307_v42  ;;  %v562_v42 = vsub.f32 %v3602_v19, %v561_v39 }
 0x369   :  { %3199 = vmatpush3.xpose.msk.msra.mxu0 %vm152_vm2, %v1513_v37  ;;  %3200 = vmatprep.mubr.msk.f32.mxu0 %vm3482_vm1, %v3481_v6 }
 0x36a   :  { %3208 = vmatprep.subr.mxu0 %v3481_v6 }
 0x36b   :  { %v1679_v44 = vpop.permute.xlu1 %1678 }
 0x36c   :  { %3201 = vmatmul.mubr.msk.f32.vlgmr.msra.gmra.mxu0 %vm152_vm2, %v3613_v21 }
 0x36d   :  { %3209 = vmatpush3.xpose.msk.msra.mxu0 %vm152_vm2, %v1679_v44  ;;  %3210 = vmatprep.mubr.msk.f32.mxu0 %vm3482_vm1, %v3481_v6  ;;  %v563_v44 = vmul.f32 1.442695, %v562_v42 }
 0x36e   :  { %3218 = vmatprep.subr.mxu0 %v3481_v6 }
 0x36f   :  { %v1844_v46 = vpop.permute.xlu1 %1843 }
 0x370   :  { %3211 = vmatmul.mubr.msk.f32.vlgmr.msra.gmra.mxu0 %vm152_vm2, %v1677_v40 }
 0x371   :  { %3219 = vmatpush3.xpose.msk.msra.mxu0 %vm152_vm2, %v1844_v46  ;;  %3220 = vmatprep.mubr.msk.f32.mxu0 %vm3482_vm1, %v3481_v6 }
 0x372   :  { %3228 = vmatprep.subr.mxu0 %v3481_v6 }
 0x373   :  { %v2009_v47 = vpop.permute.xlu1 %2008 }
 0x374   :  { %3221 = vmatmul.mubr.msk.f32.vlgmr.msra.gmra.mxu0 %vm152_vm2, %v1842_v43 }
 0x375   :  { %3229 = vmatpush3.xpose.msk.msra.mxu0 %vm152_vm2, %v2009_v47  ;;  %3230 = vmatprep.mubr.msk.f32.mxu0 %vm3482_vm1, %v3481_v6 }
 0x376   :  { %3238 = vmatprep.subr.mxu0 %v3481_v6 }
 0x377   :  { %v2174_v49 = vpop.permute.xlu1 %2173 }
 0x378   :  { %3231 = vmatmul.mubr.msk.f32.vlgmr.msra.gmra.mxu0 %vm152_vm2, %v2007_v45 }
 0x379   :  { %3239 = vmatpush3.xpose.msk.msra.mxu0 %vm152_vm2, %v2174_v49  ;;  %3240 = vmatprep.mubr.msk.f32.mxu0 %vm3482_vm1, %v3481_v6 }
 0x37a   :  { %v3703_v50 = vpop.f32.mrf.mxu0  ;;  %3248 = vmatprep.subr.mxu0 %v3481_v6 }
 0x37b   :  { %v2339_v52 = vpop.permute.xlu1 %2338  ;;  %v724_v53 = vsel %vm228_vm3, %v3703_v50, -inf }
 0x37c   :  { %725 = vmax.xlane.f32.xlu0 %v724_v53  ;;  %v3152_v54 = vpop.f32.mrf.mxu0  ;;  %3241 = vmatmul.mubr.msk.f32.vlgmr.msra.gmra.mxu0 %vm152_vm2, %v2172_v48 }
 0x37d   :  { %3249 = vmatpush3.xpose.msk.msra.mxu0 %vm152_vm2, %v2339_v52  ;;  %3250 = vmatprep.mubr.msk.f32.mxu0 %vm3482_vm1, %v3481_v6 }
 0x37e   :  { %3258 = vmatprep.subr.mxu0 %v3481_v6 }
 0x37f   :  { %v2504_v55 = vpop.permute.xlu1 %2503 }
 0x380   :  { %3251 = vmatmul.mubr.msk.f32.vlgmr.msra.gmra.mxu0 %vm152_vm2, %v2337_v51 }
 0x381   :  { %3259 = vmatpush3.xpose.msk.msra.mxu0 %vm152_vm2, %v2504_v55  ;;  %3260 = vmatprep.mubr.msk.f32.mxu0 %vm3482_vm1, %v3481_v6 }
 0x382   :  { %3268 = vmatprep.subr.mxu0 %v3481_v6 }
 0x383   :  { %v2669_v57 = vpop.permute.xlu1 %2668 }
 0x384   :  { %3261 = vmatmul.mubr.msk.f32.vlgmr.msra.gmra.mxu0 %vm152_vm2, %v2502_v56 }
 0x385   :  { %3269 = vmatpush3.xpose.msk.msra.mxu0 %vm152_vm2, %v2669_v57  ;;  %3270 = vmatprep.mubr.msk.f32.mxu0 %vm3482_vm1, %v3481_v6 }
 0x388   :  { %3271 = vmatmul.mubr.msk.f32.vlgmr.msra.gmra.mxu0 %vm152_vm2, %v2667_v58 }
 0x405   :  { %v726_v40 = vpop.xlane.xlu0 %725 }
 0x406   :  { %v727_v41 = vsub.f32 %v3703_v50, %v726_v40 }
 0x408   :  { %v728_v43 = vmul.f32 1.442695, %v727_v41 }
 0x40a   :  { %3330 = vpow2.f32 %v728_v43 }
 0x40b   :  { %3332 = vpow2.f32 %v563_v44 }
 0x417   :  { %v3785_v45 = vpop.eup %3330 }
 0x418   :  { %v3723_v59 = vpop.f32.mrf.mxu0  ;;  %v730_v46 = vsel %vm228_vm3, %v3785_v45, 0.0  ;;  %v3789_v47 = vpop.eup %3332 }
 0x419   :  { %v889_v60 = vsel %vm228_vm3, %v3723_v59, -inf  ;;  %v565_v48 = vsel %vm228_vm3, %v3789_v47, 0.0 }
 0x41a   :  { %890 = vmax.xlane.f32.xlu1 %v889_v60  ;;  %v3162_v61 = vpop.f32.mrf.mxu0 }
 0x420   :  { %v3727_v62 = vpop.f32.mrf.mxu1  ;;  %v3729_v63 = vpop.f32.mrf.mxu0 }
 0x421   :  { %v1054_v0 = vsel %vm228_vm3, %v3729_v63, -inf }
 0x422   :  { %1055 = vmax.xlane.f32.xlu0 %v1054_v0  ;;  %v3127_v1 = vpop.f32.mrf.mxu1  ;;  %v3172_v2 = vpop.f32.mrf.mxu0 }
 0x424   :  { %v3733_v3 = vpop.f32.mrf.mxu1  ;;  %v3735_v4 = vpop.f32.mrf.mxu0 }
 0x425   :  { %v1219_v5 = vsel %vm228_vm3, %v3735_v4, -inf  ;;  %v394_v41 = vsel %vm228_vm3, %v3733_v3, -inf }
 0x426   :  { %1220 = vmax.xlane.f32.xlu1 %v1219_v5  ;;  %v3132_v9 = vpop.f32.mrf.mxu1  ;;  %v3182_v10 = vpop.f32.mrf.mxu0 }
 0x428   :  { %v3739_v11 = vpop.f32.mrf.mxu0 }
 0x429   :  { %v1384_v12 = vsel %vm228_vm3, %v3739_v11, -inf }
 0x42a   :  { %1385 = vmax.xlane.f32.xlu0 %v1384_v12  ;;  %v3192_v13 = vpop.f32.mrf.mxu0 }
 0x42c   :  { %v3743_v14 = vpop.f32.mrf.mxu0 }
 0x42d   :  { %v1589_v15 = vsel %vm228_vm3, %v3743_v14, -inf }
 0x42e   :  { %1590 = vmax.xlane.f32.xlu1 %v1589_v15  ;;  %v3202_v16 = vpop.f32.mrf.mxu0 }
 0x430   :  { %v3747_v17 = vpop.f32.mrf.mxu0 }
 0x431   :  { %v1754_v18 = vsel %vm228_vm3, %v3747_v17, -inf }
 0x432   :  { %1755 = vmax.xlane.f32.xlu0 %v1754_v18  ;;  %v3212_v20 = vpop.f32.mrf.mxu0 }
 0x434   :  { %v3751_v21 = vpop.f32.mrf.mxu0 }
 0x435   :  { %v1919_v22 = vsel %vm228_vm3, %v3751_v21, -inf }
 0x436   :  { %1920 = vmax.xlane.f32.xlu1 %v1919_v22  ;;  %v3222_v23 = vpop.f32.mrf.mxu0 }
 0x438   :  { %v3755_v24 = vpop.f32.mrf.mxu0 }
 0x439   :  { %v2084_v25 = vsel %vm228_vm3, %v3755_v24, -inf }
 0x43a   :  { %2085 = vmax.xlane.f32.xlu0 %v2084_v25  ;;  %v3232_v26 = vpop.f32.mrf.mxu0 }
 0x43c   :  { %v3759_v27 = vpop.f32.mrf.mxu0 }
 0x43d   :  { %v2249_v28 = vsel %vm228_vm3, %v3759_v27, -inf }
 0x43e   :  { %2250 = vmax.xlane.f32.xlu1 %v2249_v28  ;;  %v3242_v29 = vpop.f32.mrf.mxu0 }
 0x440   :  { %v3763_v30 = vpop.f32.mrf.mxu0 }
 0x441   :  { %v2414_v31 = vsel %vm228_vm3, %v3763_v30, -inf }
 0x442   :  { %2415 = vmax.xlane.f32.xlu0 %v2414_v31  ;;  %v3252_v32 = vpop.f32.mrf.mxu0 }
 0x444   :  { %v3767_v33 = vpop.f32.mrf.mxu0 }
 0x445   :  { %v2579_v34 = vsel %vm228_vm3, %v3767_v33, -inf }
 0x446   :  { %2580 = vmax.xlane.f32.xlu1 %v2579_v34  ;;  %v3262_v35 = vpop.f32.mrf.mxu0 }
 0x448   :  { %v3771_v36 = vpop.f32.mrf.mxu0 }
 0x449   :  { %v2744_v37 = vsel %vm228_vm3, %v3771_v36, -inf }
 0x44a   :  { %2745 = vmax.xlane.f32.xlu0 %v2744_v37  ;;  %v3272_v38 = vpop.f32.mrf.mxu0 }
 0x457   :  { %570 = vrot.lane.b32.xlu1 %v3566_v8, %s3499_s19 }
 0x45b   :  { %735 = vrot.lane.b32.xlu1 %v3566_v8, %s3500_s22 }
 0x460   :  { %405 = vrot.lane.b32.xlu0 %v3566_v8, %s3501_s23 }
 0x464   :  { %900 = vrot.lane.b32.xlu0 %v3566_v8, %s3502_s24 }
 0x47f   :  { %731 = vadd.xlane.f32.xlu1 %v730_v46 }
 0x483   :  { %566 = vadd.xlane.f32.xlu0 %v565_v48 }
 0x4a3   :  { %v891_v49 = vpop.xlane.xlu1 %890 }
 0x4a4   :  { %v892_v50 = vsub.f32 %v3723_v59, %v891_v49 }
 0x4a6   :  { %v893_v19 = vmul.f32 1.442695, %v892_v50 }
 0x4a8   :  { %3334 = vpow2.f32 %v893_v19 }
 0x4ab   :  { %v1056_v51 = vpop.xlane.xlu0 %1055 }
 0x4ac   :  { %v1057_v52 = vsub.f32 %v3729_v63, %v1056_v51 }
 0x4ae   :  { %v1058_v53 = vmul.f32 1.442695, %v1057_v52 }
 0x4af   :  { %v1221_v54 = vpop.xlane.xlu1 %1220 }
 0x4b0   :  { %3336 = vpow2.f32 %v1058_v53  ;;  %v1222_v55 = vsub.f32 %v3735_v4, %v1221_v54 }
 0x4b2   :  { %v1223_v56 = vmul.f32 1.442695, %v1222_v55 }
 0x4b3   :  { %v1386_v57 = vpop.xlane.xlu0 %1385 }
 0x4b4   :  { %3338 = vpow2.f32 %v1223_v56  ;;  %v1387_v58 = vsub.f32 %v3739_v11, %v1386_v57 }
 0x4b5   :  { %v3797_v60 = vpop.eup %3334 }
 0x4b6   :  { %v1388_v61 = vmul.f32 1.442695, %v1387_v58  ;;  %v895_v59 = vsel %vm228_vm3, %v3797_v60, 0.0 }
 0x4b7   :  { %v1591_v0 = vpop.xlane.xlu1 %1590  ;;  %896 = vadd.xlane.f32.xlu0 %v895_v59 }
 0x4b8   :  { %3340 = vpow2.f32 %v1388_v61  ;;  %v1592_v63 = vsub.f32 %v3743_v14, %v1591_v0 }
 0x4ba   :  { %v1593_v1 = vmul.f32 1.442695, %v1592_v63 }
 0x4bb   :  { %v1756_v2 = vpop.xlane.xlu0 %1755 }
 0x4bc   :  { %3342 = vpow2.f32 %v1593_v1  ;;  %v1757_v4 = vsub.f32 %v3747_v17, %v1756_v2 }
 0x4bd   :  { %v3803_v5 = vpop.eup %3336 }
 0x4be   :  { %v1758_v9 = vmul.f32 1.442695, %v1757_v4  ;;  %v1060_v10 = vsel %vm228_vm3, %v3803_v5, 0.0 }
 0x4bf   :  { %v1921_v11 = vpop.xlane.xlu1 %1920  ;;  %1061 = vadd.xlane.f32.xlu1 %v1060_v10 }
 0x4c0   :  { %3344 = vpow2.f32 %v1758_v9  ;;  %v1922_v12 = vsub.f32 %v3751_v21, %v1921_v11 }
 0x4c1   :  { %v3808_v13 = vpop.eup %3338 }
 0x4c2   :  { %v1923_v15 = vmul.f32 1.442695, %v1922_v12  ;;  %v1225_v14 = vsel %vm228_vm3, %v3808_v13, 0.0 }
 0x4c3   :  { %1226 = vadd.xlane.f32.xlu0 %v1225_v14  ;;  %v2086_v16 = vpop.xlane.xlu0 %2085 }
 0x4c4   :  { %3346 = vpow2.f32 %v1923_v15  ;;  %v2087_v17 = vsub.f32 %v3755_v24, %v2086_v16 }
 0x4c5   :  { %v3813_v18 = vpop.eup %3340 }
 0x4c6   :  { %v2088_v20 = vmul.f32 1.442695, %v2087_v17  ;;  %v1390_v22 = vsel %vm228_vm3, %v3813_v18, 0.0 }
 0x4c7   :  { %v2251_v23 = vpop.xlane.xlu1 %2250  ;;  %1391 = vadd.xlane.f32.xlu1 %v1390_v22 }
 0x4c8   :  { %3348 = vpow2.f32 %v2088_v20  ;;  %v2252_v21 = vsub.f32 %v3759_v27, %v2251_v23 }
 0x4c9   :  { %v3818_v25 = vpop.eup %3342 }
 0x4ca   :  { %v2253_v26 = vmul.f32 1.442695, %v2252_v21  ;;  %v1595_v28 = vsel %vm228_vm3, %v3818_v25, 0.0 }
 0x4cb   :  { %1596 = vadd.xlane.f32.xlu1 %v1595_v28  ;;  %v2416_v31 = vpop.xlane.xlu0 %2415 }
 0x4cc   :  { %3350 = vpow2.f32 %v2253_v26  ;;  %v2417_v59 = vsub.f32 %v3763_v30, %v2416_v31 }
 0x4cd   :  { %v3822_v24 = vpop.eup %3344 }
 0x4ce   :  { %v1760_v29 = vsel %vm228_vm3, %v3822_v24, 0.0  ;;  %v2418_v0 = vmul.f32 1.442695, %v2417_v59 }
 0x4cf   :  { %1761 = vadd.xlane.f32.xlu0 %v1760_v29  ;;  %v2581_v48 = vpop.xlane.xlu1 %2580 }
 0x4d0   :  { %v2582_v63 = vsub.f32 %v3767_v33, %v2581_v48 }
 0x4d1   :  { %v3826_v32 = vpop.eup %3346 }
 0x4d2   :  { %v1925_v27 = vsel %vm228_vm3, %v3826_v32, 0.0  ;;  %v2583_v1 = vmul.f32 1.442695, %v2582_v63 }
 0x4d3   :  { %1926 = vadd.xlane.f32.xlu1 %v1925_v27  ;;  %v2746_v34 = vpop.xlane.xlu0 %2745  ;;  %v571_v49 = vpop.permute.xlu1 %570 }
 0x4d4   :  { %v2747_v42 = vsub.f32 %v3771_v36, %v2746_v34 }
 0x4d5   :  { %v3830_v35 = vpop.eup %3348 }
 0x4d6   :  { %v2090_v37 = vsel %vm228_vm3, %v3830_v35, 0.0  ;;  %v2748_v43 = vmul.f32 1.442695, %v2747_v42 }
 0x4d7   :  { %2091 = vadd.xlane.f32.xlu1 %v2090_v37  ;;  %v406_v38 = vpop.permute.xlu0 %405  ;;  %v736_v50 = vpop.permute.xlu1 %735 }
 0x4d8   :  { %3134 = vmatpush3.msra.mxu1 %v406_v38  ;;  %3352 = vpow2.f32 %v2748_v43 }
 0x4d9   :  { %v3834_v39 = vpop.eup %3350  ;;  %3143 = vmatprep.subr.mxu1 %v3481_v6 }
 0x4da   :  { %v2255_v40 = vsel %vm228_vm3, %v3834_v39, 0.0 }
 0x4db   :  { %2256 = vadd.xlane.f32.xlu0 %v2255_v40  ;;  %395 = vmax.xlane.f32.xlu1 %v394_v41 }
 0x4e5   :  { %v3845_v44 = vpop.eup %3352 }
 0x4e6   :  { %v2750_v46 = vsel %vm228_vm3, %v3845_v44, 0.0 }
 0x4ec   :  { %1065 = vrot.lane.b32.xlu1 %v3566_v8, %s3503_s25 }
 0x4f1   :  { %1395 = vrot.lane.b32.xlu0 %v3566_v8, %s3504_s26 }
 0x508   :  { %v732_v19 = vpop.xlane.xlu1 %731 }
 0x510   :  { %2751 = vadd.xlane.f32.xlu0 %v2750_v46 }
 0x526   :  { %2425 = vrot.lane.b32.xlu0 %v3564_v7, %s3503_s25 }
 0x548   :  { %v1062_v51 = vpop.xlane.xlu1 %1061 }
 0x550   :  { %v1392_v52 = vpop.xlane.xlu1 %1391 }
 0x554   :  { %v3850_v53 = vpop.xlane.xlu1 %1596 }
 0x55c   :  { %v3852_v54 = vpop.xlane.xlu1 %1926 }
 0x560   :  { %v3854_v36 = vpop.xlane.xlu1 %2091 }
 0x564   :  { %v396_v55 = vpop.xlane.xlu1 %395 }
 0x565   :  { %v397_v56 = vsub.f32 %v3733_v3, %v396_v55 }
 0x567   :  { %v398_v57 = vmul.f32 1.442695, %v397_v56 }
 0x568   :  { %v1066_v30 = vpop.permute.xlu1 %1065 }
 0x569   :  { %3354 = vpow2.f32 %v398_v57 }
 0x56a   :  { %3356 = vpow2.f32 %v2418_v0 }
 0x56b   :  { %3358 = vpow2.f32 %v2583_v1 }
 0x576   :  { %v3355_v58 = vpop.eup %3354 }
 0x577   :  { %v400_v61 = vsel %vm228_vm3, %v3355_v58, 0.0  ;;  %v3861_v2 = vpop.eup %3356 }
 0x578   :  { %401 = vadd.xlane.f32.xlu1 %v400_v61  ;;  %v2420_v3 = vsel %vm228_vm3, %v3861_v2, 0.0  ;;  %v3865_v4 = vpop.eup %3358 }
 0x579   :  { %v2585_v9 = vsel %vm228_vm3, %v3865_v4, 0.0 }
 0x589   :  { %1230 = vrot.lane.b32.xlu1 %v3566_v8, %s3505_s27  ;;  %v901_v8 = vpop.permute.xlu0 %900 }
 0x58d   :  { %v567_v33 = vpop.xlane.xlu0 %566 }
 0x591   :  { %v897_v11 = vpop.xlane.xlu0 %896 }
 0x595   :  { %v1227_v16 = vpop.xlane.xlu0 %1226 }
 0x5ad   :  { %2421 = vadd.xlane.f32.xlu1 %v2420_v3 }
 0x5b1   :  { %2586 = vadd.xlane.f32.xlu1 %v2585_v9 }
 0x5c2   :  { %1600 = vrot.lane.b32.xlu1 %v3564_v7, %s3483_s0  ;;  %s3510_s0 = smov 24  }
 0x5c6   :  { %1765 = vrot.lane.b32.xlu1 %v3564_v7, %s3501_s23 }
 0x5ca   :  { %1930 = vrot.lane.b32.xlu1 %v3564_v7, %s3499_s19 }
 0x5ce   :  { %2095 = vrot.lane.b32.xlu1 %v3564_v7, %s3500_s22 }
 0x5d2   :  { %2260 = vrot.lane.b32.xlu1 %v3564_v7, %s3502_s24 }
 0x5d6   :  { %2590 = vrot.lane.b32.xlu1 %v3564_v7, %s3505_s27 }
 0x5da   :  { %2755 = vrot.lane.b32.xlu1 %v3564_v7, %s3504_s26 }
 0x601   :  { %v402_v10 = vpop.xlane.xlu1 %401 }
 0x602   :  { %3360 = vrcp.f32 %v402_v10 }
 0x603   :  { %3362 = vrcp.f32 %v567_v33 }
 0x604   :  { %3364 = vrcp.f32 %v732_v19 }
 0x605   :  { %3366 = vrcp.f32 %v897_v11  ;;  %v1231_v29 = vpop.permute.xlu1 %1230 }
 0x606   :  { %3368 = vrcp.f32 %v1062_v51 }
 0x607   :  { %3370 = vrcp.f32 %v1227_v16  ;;  %v2868_v16 = vld [vmem:[#allocation7 + $0x10] sm:$0xff] }
 0x608   :  { %3372 = vrcp.f32 %v1392_v52 }
 0x609   :  { %3374 = vrcp.f32 %v3850_v53 }
 0x60f   :  { %v3361_v12 = vpop.eup %3360 }
 0x610   :  { %v404_v15 = vmul.f32 %v3361_v12, %v3355_v58  ;;  %v3363_v14 = vpop.eup %3362 }
 0x611   :  { %v569_v7 = vmul.f32 %v3363_v14, %v3789_v47  ;;  %v3365_v17 = vpop.eup %3364  ;;  %v1762_v47 = vpop.xlane.xlu0 %1761  ;;  %v2869_v14 = vld [vmem:[#allocation7 + $0x18] sm:$0xff] }
 0x612   :  { %3136 = vmatmul.mubr.msk.f32.vlgmr.msra.gmra.mxu1 %vm228_vm3, %v404_v15  ;;  %v734_v20 = vmul.f32 %v3365_v17, %v3785_v45  ;;  %v3367_v22 = vpop.eup %3366  ;;  %3376 = vrcp.f32 %v1762_v47  ;;  %3278 = vmatprep.subr.mxu0 %v2869_v14 }
 0x613   :  { %3144 = vmatpush3.msra.mxu1 %v571_v49  ;;  %3145 = vmatprep.mubr.msk.f32.mxu1 %vm3482_vm1, %v3481_v6  ;;  %v899_v23 = vmul.f32 %v3367_v22, %v3797_v60  ;;  %v3369_v21 = vpop.eup %3368  ;;  %3378 = vrcp.f32 %v3852_v54  ;;  %v2866_v22 = vld [vmem:[#allocation7] sm:$0xff] }
 0x614   :  { %3153 = vmatprep.subr.mxu1 %v3481_v6  ;;  %v1064_v26 = vmul.f32 %v3369_v21, %v3803_v5  ;;  %v3371_v28 = vpop.eup %3370  ;;  %3380 = vrcp.f32 %v3854_v36  ;;  %3279 = vmatpush3.msra.mxu0 %v2869_v14 }
 0x615   :  { %v2257_v45 = vpop.xlane.xlu0 %2256  ;;  %v1229_v60 = vmul.f32 %v3371_v28, %v3808_v13  ;;  %v3373_v31 = vpop.eup %3372  ;;  %3280 = vmatprep.subr.mxu0 %v2868_v16 }
 0x616   :  { %3146 = vmatmul.mubr.msk.f32.vlgmr.msra.gmra.mxu1 %vm228_vm3, %v569_v7  ;;  %v1394_v5 = vmul.f32 %v3373_v31, %v3813_v18  ;;  %v3375_v37 = vpop.eup %3374  ;;  %3382 = vrcp.f32 %v2257_v45  ;;  %3281 = vmatpush3.msra.mxu0 %v2868_v16 }
 0x617   :  { %3154 = vmatpush3.msra.mxu1 %v736_v50  ;;  %3155 = vmatprep.mubr.msk.f32.mxu1 %vm3482_vm1, %v3481_v6  ;;  %v1599_v18 = vmul.f32 %v3375_v37, %v3818_v25 }
 0x618   :  { %3163 = vmatprep.subr.mxu1 %v3481_v6 }
 0x619   :  { %v1396_v27 = vpop.permute.xlu0 %1395 }
 0x61a   :  { %3156 = vmatmul.mubr.msk.f32.vlgmr.msra.gmra.mxu1 %vm228_vm3, %v734_v20  ;;  %v2867_v20 = vld [vmem:[#allocation7 + $0x8] sm:$0xff] }
 0x61b   :  { %3164 = vmatpush3.msra.mxu1 %v901_v8  ;;  %3165 = vmatprep.mubr.msk.f32.mxu1 %vm3482_vm1, %v3481_v6 }
 0x61c   :  { %3173 = vmatprep.subr.mxu1 %v3481_v6  ;;  %3282 = vmatprep.subr.mxu0 %v2867_v20 }
 0x61d   :  { %v2752_v49 = vpop.xlane.xlu0 %2751  ;;  %3283 = vmatpush3.msra.mxu0 %v2867_v20 }
 0x61e   :  { %3166 = vmatmul.mubr.msk.f32.vlgmr.msra.gmra.mxu1 %vm228_vm3, %v899_v23  ;;  %3284 = vmatprep.subr.mxu0 %v2866_v22 }
 0x61f   :  { %3174 = vmatpush3.msra.mxu1 %v1066_v30  ;;  %3175 = vmatprep.mubr.msk.f32.mxu1 %vm3482_vm1, %v3481_v6  ;;  %v3377_v40 = vpop.eup %3376 }
 0x620   :  { %3183 = vmatprep.subr.mxu1 %v3481_v6  ;;  %v1764_v42 = vmul.f32 %v3377_v40, %v3822_v24  ;;  %v3379_v43 = vpop.eup %3378  ;;  %3285 = vmatpush3.msra.mxu0 %v2866_v22 }
 0x621   :  { %v1929_v46 = vmul.f32 %v3379_v43, %v3826_v32  ;;  %v3381_v48 = vpop.eup %3380  ;;  %v2426_v53 = vpop.permute.xlu0 %2425 }
 0x622   :  { %3176 = vmatmul.mubr.msk.f32.vlgmr.msra.gmra.mxu1 %vm228_vm3, %v1064_v26  ;;  %v2094_v50 = vmul.f32 %v3381_v48, %v3830_v35 }
 0x623   :  { %3184 = vmatpush3.msra.mxu1 %v1231_v29  ;;  %3185 = vmatprep.mubr.msk.f32.mxu1 %vm3482_vm1, %v3481_v6  ;;  %v3383_v19 = vpop.eup %3382 }
 0x624   :  { %3193 = vmatprep.subr.mxu1 %v3481_v6  ;;  %v2259_v51 = vmul.f32 %v3383_v19, %v3834_v39 }
 0x626   :  { %3186 = vmatmul.mubr.msk.f32.vlgmr.msra.gmra.mxu1 %vm228_vm3, %v1229_v60 }
 0x627   :  { %3194 = vmatpush3.msra.mxu1 %v1396_v27  ;;  %3195 = vmatprep.mubr.msk.f32.mxu1 %vm3482_vm1, %v3481_v6 }
 0x628   :  { %3203 = vmatprep.subr.mxu1 %v3481_v6 }
 0x62a   :  { %3196 = vmatmul.mubr.msk.f32.vlgmr.msra.gmra.mxu1 %vm228_vm3, %v1394_v5 }
 0x62b   :  { %3205 = vmatprep.mubr.msk.f32.mxu1 %vm3482_vm1, %v3481_v6 }
 0x636   :  { %v2422_v13 = vpop.xlane.xlu1 %2421 }
 0x637   :  { %3384 = vrcp.f32 %v2422_v13 }
 0x63a   :  { %v2587_v34 = vpop.xlane.xlu1 %2586 }
 0x63b   :  { %3386 = vrcp.f32 %v2587_v34 }
 0x63c   :  { %3388 = vrcp.f32 %v2752_v49 }
 0x63e   :  { %v1601_v38 = vpop.permute.xlu1 %1600 }
 0x63f   :  { %3204 = vmatpush3.msra.mxu1 %v1601_v38 }
 0x640   :  { %3206 = vmatmul.mubr.msk.f32.vlgmr.msra.gmra.mxu1 %vm228_vm3, %v1599_v18  ;;  %3213 = vmatprep.subr.mxu1 %v3481_v6 }
 0x641   :  { %3215 = vmatprep.mubr.msk.f32.mxu1 %vm3482_vm1, %v3481_v6 }
 0x642   :  { %v1766_v41 = vpop.permute.xlu1 %1765 }
 0x643   :  { %3214 = vmatpush3.msra.mxu1 %v1766_v41 }
 0x644   :  { %3216 = vmatmul.mubr.msk.f32.vlgmr.msra.gmra.mxu1 %vm228_vm3, %v1764_v42  ;;  %3223 = vmatprep.subr.mxu1 %v3481_v6  ;;  %v3385_v52 = vpop.eup %3384 }
 0x645   :  { %3225 = vmatprep.mubr.msk.f32.mxu1 %vm3482_vm1, %v3481_v6  ;;  %v2424_v54 = vmul.f32 %v3385_v52, %v3861_v2 }
 0x646   :  { %v1931_v25 = vpop.permute.xlu1 %1930 }
 0x647   :  { %3224 = vmatpush3.msra.mxu1 %v1931_v25 }
 0x648   :  { %3226 = vmatmul.mubr.msk.f32.vlgmr.msra.gmra.mxu1 %vm228_vm3, %v1929_v46  ;;  %3233 = vmatprep.subr.mxu1 %v3481_v6  ;;  %v3387_v36 = vpop.eup %3386 }
 0x649   :  { %3235 = vmatprep.mubr.msk.f32.mxu1 %vm3482_vm1, %v3481_v6  ;;  %v2589_v55 = vmul.f32 %v3387_v36, %v3865_v4  ;;  %v3389_v56 = vpop.eup %3388 }
 0x64a   :  { %v2096_v24 = vpop.permute.xlu1 %2095  ;;  %v2754_v57 = vmul.f32 %v3389_v56, %v3845_v44  ;;  %v3028_v56 = vld [vmem:[%s3999_s3] ss:$0 sm:$0xff] }
 0x64b   :  { %3234 = vmatpush3.msra.mxu1 %v2096_v24 }
 0x64c   :  { %3236 = vmatmul.mubr.msk.f32.vlgmr.msra.gmra.mxu1 %vm228_vm3, %v2094_v50  ;;  %3243 = vmatprep.subr.mxu1 %v3481_v6 }
 0x64d   :  { %3245 = vmatprep.mubr.msk.f32.mxu1 %vm3482_vm1, %v3481_v6 }
 0x64e   :  { %v2261_v32 = vpop.permute.xlu1 %2260 }
 0x64f   :  { %3244 = vmatpush3.msra.mxu1 %v2261_v32 }
 0x650   :  { %3246 = vmatmul.mubr.msk.f32.vlgmr.msra.gmra.mxu1 %vm228_vm3, %v2259_v51  ;;  %3253 = vmatprep.subr.mxu1 %v3481_v6 }
 0x651   :  { %3254 = vmatpush3.msra.mxu1 %v2426_v53  ;;  %3255 = vmatprep.mubr.msk.f32.mxu1 %vm3482_vm1, %v3481_v6 }
 0x652   :  { %v2591_v35 = vpop.permute.xlu1 %2590  ;;  %3263 = vmatprep.subr.mxu1 %v3481_v6 }
 0x654   :  { %3256 = vmatmul.mubr.msk.f32.vlgmr.msra.gmra.mxu1 %vm228_vm3, %v2424_v54 }
 0x655   :  { %3264 = vmatpush3.msra.mxu1 %v2591_v35  ;;  %3265 = vmatprep.mubr.msk.f32.mxu1 %vm3482_vm1, %v3481_v6 }
 0x656   :  { %v2756_v39 = vpop.permute.xlu1 %2755  ;;  %3273 = vmatprep.subr.mxu1 %v3481_v6 }
 0x658   :  { %3266 = vmatmul.mubr.msk.f32.vlgmr.msra.gmra.mxu1 %vm228_vm3, %v2589_v55 }
 0x659   :  { %3274 = vmatpush3.msra.mxu1 %v2756_v39  ;;  %3275 = vmatprep.mubr.msk.f32.mxu1 %vm3482_vm1, %v3481_v6 }
 0x65c   :  { %3276 = vmatmul.mubr.msk.f32.vlgmr.msra.gmra.mxu1 %vm228_vm3, %v2754_v57 }
 0x6d2   :  { %v477_v58 = vpop.f32.mrf.mxu1 }
 0x6d3   :  { %1472 = vrot.lane.b32.xlu1 %v477_v58, %s3506_s28 }
 0x6d4   :  { %v3137_v61 = vpop.f32.mrf.mxu1 }
 0x6d6   :  { %v642_v59 = vpop.f32.mrf.mxu1 }
 0x6d7   :  { %1476 = vrot.lane.b32.xlu1 %v642_v59, %s3479_s21 }
 0x6d8   :  { %v3147_v0 = vpop.f32.mrf.mxu1 }
 0x6da   :  { %v807_v63 = vpop.f32.mrf.mxu1 }
 0x6db   :  { %1480 = vrot.lane.b32.xlu1 %v807_v63, %s3507_s29 }
 0x6dc   :  { %v3157_v1 = vpop.f32.mrf.mxu1 }
 0x6de   :  { %v972_v2 = vpop.f32.mrf.mxu1 }
 0x6df   :  { %1484 = vrot.lane.b32.xlu1 %v972_v2, %s3508_s1 }
 0x6e0   :  { %v3167_v6 = vpop.f32.mrf.mxu1 }
 0x6e2   :  { %v1137_v44 = vpop.f32.mrf.mxu1 }
 0x6e3   :  { %1488 = vrot.lane.b32.xlu1 %v1137_v44, %s3509_s30 }
 0x6e4   :  { %v3177_v3 = vpop.f32.mrf.mxu1 }
 0x6e6   :  { %v1302_v4 = vpop.f32.mrf.mxu1 }
 0x6e7   :  { %1492 = vrot.lane.b32.xlu1 %v1302_v4, %s3510_s0 }
 0x6e8   :  { %v3187_v9 = vpop.f32.mrf.mxu1 }
 0x6ea   :  { %v1467_v8 = vpop.f32.mrf.mxu1 }
 0x6ec   :  { %v3197_v30 = vpop.f32.mrf.mxu1 }
 0x700   :  { %v3960_v33 = vpop.f32.mrf.mxu1 }
 0x702   :  { %v3207_v10 = vpop.f32.mrf.mxu1 }
 0x704   :  { %v1837_v11 = vpop.f32.mrf.mxu1 }
 0x705   :  { %2832 = vrot.lane.b32.xlu1 %v1837_v11, %s3506_s28 }
 0x706   :  { %v3217_v12 = vpop.f32.mrf.mxu1 }
 0x708   :  { %v2002_v15 = vpop.f32.mrf.mxu1 }
 0x709   :  { %1496 = vrot.lane.b32.xlu1 %v1467_v8, %s3511_s2  ;;  %2836 = vrot.lane.b32.xlu0 %v2002_v15, %s3479_s21 }
 0x70a   :  { %v3227_v7 = vpop.f32.mrf.mxu1 }
 0x70c   :  { %v2167_v17 = vpop.f32.mrf.mxu1 }
 0x70d   :  { %2840 = vrot.lane.b32.xlu0 %v2167_v17, %s3507_s29 }
 0x70e   :  { %v3237_v47 = vpop.f32.mrf.mxu1 }
 0x710   :  { %v2332_v23 = vpop.f32.mrf.mxu1 }
 0x711   :  { %2844 = vrot.lane.b32.xlu0 %v2332_v23, %s3508_s1 }
 0x712   :  { %v3247_v21 = vpop.f32.mrf.mxu1 }
 0x714   :  { %v2497_v45 = vpop.f32.mrf.mxu1 }
 0x715   :  { %2848 = vrot.lane.b32.xlu0 %v2497_v45, %s3509_s30 }
 0x716   :  { %v3257_v26 = vpop.f32.mrf.mxu1 }
 0x718   :  { %v2662_v28 = vpop.f32.mrf.mxu1 }
 0x719   :  { %2852 = vrot.lane.b32.xlu0 %v2662_v28, %s3510_s0 }
 0x71a   :  { %v3267_v29 = vpop.f32.mrf.mxu1 }
 0x71c   :  { %v2827_v60 = vpop.f32.mrf.mxu1 }
 0x71d   :  { %2856 = vrot.lane.b32.xlu1 %v2827_v60, %s3511_s2 }
 0x71e   :  { %v3277_v31 = vpop.f32.mrf.mxu1 }
 0x745   :  { %v1473_v27 = vpop.permute.xlu1 %1472 }
 0x746   :  { %v1499_v18 = vsel %vm152_vm2, %v3727_v62, %v1473_v27 }
 0x749   :  { %v1477_v5 = vpop.permute.xlu1 %1476 }
 0x74a   :  { %v1500_v40 = vsel %vm228_vm3, %v1499_v18, %v1477_v5 }
 0x74d   :  { %v1481_v13 = vpop.permute.xlu1 %1480 }
 0x74e   :  { %v1502_v42 = vsel %vm1501_vm4, %v1500_v40, %v1481_v13 }
 0x751   :  { %v1485_v34 = vpop.permute.xlu1 %1484 }
 0x752   :  { %v1504_v43 = vsel %vm1503_vm5, %v1502_v42, %v1485_v34 }
 0x755   :  { %v1489_v37 = vpop.permute.xlu1 %1488 }
 0x756   :  { %v1506_v25 = vsel %vm1505_vm6, %v1504_v43, %v1489_v37 }
 0x759   :  { %v1493_v38 = vpop.permute.xlu1 %1492 }
 0x75a   :  { %v1508_v46 = vsel %vm1507_vm7, %v1506_v25, %v1493_v38 }
 0x777   :  { %v2833_v41 = vpop.permute.xlu1 %2832 }
 0x778   :  { %v2859_v32 = vsel %vm152_vm2, %v3960_v33, %v2833_v41 }
 0x77b   :  { %v1497_v48 = vpop.permute.xlu1 %1496  ;;  %v2837_v49 = vpop.permute.xlu0 %2836 }
 0x77c   :  { %v1510_v24 = vsel %vm1509_vm8, %v1508_v46, %v1497_v48  ;;  %v2860_v51 = vsel %vm228_vm3, %v2859_v32, %v2837_v49 }
 0x77d   :  { %3286 = vmatprep.mubr.msk.f32.mxu0 %vm65_vm0, %v1510_v24 }
 0x77f   :  { %v2841_v62 = vpop.permute.xlu0 %2840 }
 0x780   :  { %v2861_v52 = vsel %vm1501_vm4, %v2860_v51, %v2841_v62 }
 0x783   :  { %v2845_v50 = vpop.permute.xlu0 %2844 }
 0x784   :  { %v2862_v35 = vsel %vm1503_vm5, %v2861_v52, %v2845_v50 }
 0x787   :  { %v2849_v19 = vpop.permute.xlu0 %2848 }
 0x788   :  { %v2863_v54 = vsel %vm1505_vm6, %v2862_v35, %v2849_v19 }
 0x78b   :  { %v2853_v53 = vpop.permute.xlu0 %2852 }
 0x78c   :  { %v2864_v36 = vsel %vm1507_vm7, %v2863_v54, %v2853_v53 }
 0x78f   :  { %v2857_v39 = vpop.permute.xlu1 %2856 }
 0x790   :  { %v2865_v55 = vsel %vm1509_vm8, %v2864_v36, %v2857_v39 }
 0x791   :  { %3287 = vmatmul.mubr.msk.f32.vlgmr.msra.gmra.mxu0 %vm65_vm0, %v2865_v55 }
 0x851   :  { %v3288_v57 = vpop.f32.mrf.mxu0 }
 0x852   :  { %v2955_v58 = vadd.f32 %v3288_v57, %v3028_v56 }
 0x853   :  { %v2949_v61 = vpop.f32.mrf.mxu0 }
 0x854   :  { %2959 = vst.msk [vmem:[#allocation8 + $0x8] sm:$0xff] %vm65_vm0, %v2955_v58  ;;  %v2950_v59 = vadd.f32 %v3028_v56, %v2949_v61 }
 0x856   :  { %2958 = vst.msk [vmem:[#allocation8] sm:$0xff] %vm65_vm0, %v2950_v59 }
 0x857   :  { %3461 = shalt.err (!%p3458_p5)
}
 0x858   :  { %2971 = dma.vmem_to_hbm [thread:$0]  %s2966_s8, 256, %s4000_s4, [#allocation4], %s3478_s20, %s3478_s20, %s3479_s21  }
 0x859   :  { %3474 = dma.done.wait [#allocation4], 256  }
 0x85a   :  { %3475 = vsyncadd [#allocation4], 4294967040 }
 0x85b   :  { %2975 = vsyncpa [#allocation3], 1 }
 0x85c   :  { %2976 = vsyncpa [#allocation6], 1 }
 0x85d   :  { %2977 = vsyncpa [#allocation4], 1 }

</bundles_post_ra>
